<compile_context>
chip_gen: v6e
topology: v6e:2x2x1
jax: 0.10.0
libtpu: 0.0.40
codegen_flags: <defaults>
</compile_context>

<pallas_src>
import jax
import jax.numpy as jnp
from jax import lax
from jax.experimental import pallas as pl
from jax.experimental.pallas import tpu as pltpu


def _round_up(n, m):
    return ((n + m - 1) // m) * m


def lstm_fc_kernel(x_ref, w_ih_ref, w_hh_ref, b_ref, w_fc_ref, b_fc_ref, out_ref):
    # x_ref:    (BB, T, I)  one batch-block of sequences (batch_first layout, no wrapper transpose)
    # w_ih_ref: (I, 4H)     input->gates weights (pre-transposed)
    # w_hh_ref: (H, 4H)     hidden->gates weights (pre-transposed)
    # b_ref:    (1, 4H)     b_ih + b_hh (pre-combined)
    # w_fc_ref: (O, H)      final linear weight (PyTorch layout)
    # b_fc_ref: (1, O)      final linear bias
    # out_ref:  (BB, O)
    BB, T, I = x_ref.shape
    H = w_hh_ref.shape[0]
    O = out_ref.shape[1]

    w_ih = w_ih_ref[...]
    w_hh = w_hh_ref[...]
    bias = b_ref[...]

    # ---- Hoisted input projection: no dependence on h/c, so entirely off the serial chain.
    # Kept as plain traced values (T tiles of (BB, 4H) f32 ~= a handful of vregs); no VMEM
    # scratch and no dynamic slicing on the recurrence's critical path.
    gx = [
        jnp.dot(x_ref[:, t, :], w_ih,
                preferred_element_type=jnp.float32,
                precision=lax.Precision.HIGHEST) + bias
        for t in range(T)
    ]

    h = jnp.zeros((BB, H), jnp.float32)
    c = jnp.zeros((BB, H), jnp.float32)

    # Fully unrolled at trace time (T is small & static) -> the whole 8-step chain is
    # visible to the LLO scheduler, and all slices below are static.
    for t in range(T):
        gates = gx[t] + jnp.dot(h, w_hh,
                                preferred_element_type=jnp.float32,
                                precision=lax.Precision.HIGHEST)  # (BB, 4H) [i | f | g | o]

        # Full-vreg activations over the whole (BB, 4H) tile, then static lane slices.
        sig = jax.nn.sigmoid(gates)
        tnh = jnp.tanh(gates)
        i_g = sig[:, 0 * H:1 * H]
        f_g = sig[:, 1 * H:2 * H]
        g_g = tnh[:, 2 * H:3 * H]
        o_g = sig[:, 3 * H:4 * H]

        c = f_g * c + i_g * g_g
        h = o_g * jnp.tanh(c)

    w_fc = w_fc_ref[...]   # (O, H)
    b_fc = b_fc_ref[...]   # (1, O)
    if O == 1:
        # N=1 "matmul" folded into a VPU broadcast-multiply + cross-lane sum (XLU),
        # avoiding a pure-latency MXU push/pop on the tail.
        out_ref[...] = jnp.sum(h * w_fc, axis=-1, keepdims=True) + b_fc
    else:
        out_ref[...] = lax.dot_general(
            h, w_fc, (((1,), (1,)), ((), ())),
            preferred_element_type=jnp.float32,
            precision=lax.Precision.HIGHEST) + b_fc


def prepare_params(params):
    """One-time parameter prep: pre-transpose weights, pre-combine biases."""
    H = params["w_hh"].shape[1]
    O = params["w_fc"].shape[0]
    return {
        "w_ih_t": jnp.transpose(params["w_ih"], (1, 0)),             # (I, 4H)
        "w_hh_t": jnp.transpose(params["w_hh"], (1, 0)),             # (H, 4H)
        "b":      (params["b_ih"] + params["b_hh"]).reshape(1, 4 * H),
        "w_fc":   params["w_fc"],                                     # (O, H) PyTorch layout
        "b_fc":   params["b_fc"].reshape(1, O),                       # (1, O)
    }


def stock_price_lstm_pallas(x, prepped, *, batch_block=None):
    """x: (B, T, input_size) float32. Returns (B, output_size) float32.

    Batches of any size are supported: B is padded up to a sublane-aligned batch block
    and processed as a 1-D parallel grid over batch blocks (splits across the two
    TensorCores on v7x; harmless on v5e/v6e).
    """
    B, T, I = x.shape
    H = prepped["w_hh_t"].shape[0]
    O = prepped["w_fc"].shape[0]

    # Batch block: at least 8 rows (sublane tile) on the MXU M-dim, capped to keep the
    # per-step working set trivially VMEM-resident.
    if batch_block is None:
        batch_block = min(_round_up(B, 8), 256)
    BB = batch_block
    B_pad = _round_up(B, BB)
    if B_pad != B:
        x = jnp.pad(x, ((0, B_pad - B), (0, 0), (0, 0)))

    grid = (B_pad // BB,)

    out = pl.pallas_call(
        lstm_fc_kernel,
        out_shape=jax.ShapeDtypeStruct((B_pad, O), jnp.float32),
        grid_spec=pltpu.PrefetchScalarGridSpec(
            num_scalar_prefetch=0,
            grid=grid,
            in_specs=[
                pl.BlockSpec((BB, T, I), lambda b: (b, 0, 0)),   # per-block input sequences
                pl.BlockSpec((I, 4 * H), lambda b: (0, 0)),      # weights: resident across grid
                pl.BlockSpec((H, 4 * H), lambda b: (0, 0)),
                pl.BlockSpec((1, 4 * H), lambda b: (0, 0)),
                pl.BlockSpec((O, H),     lambda b: (0, 0)),
                pl.BlockSpec((1, O),     lambda b: (0, 0)),
            ],
            out_specs=pl.BlockSpec((BB, O), lambda b: (b, 0)),
        ),
        compiler_params=pltpu.CompilerParams(
            dimension_semantics=("parallel",)),
    )(x, prepped["w_ih_t"], prepped["w_hh_t"], prepped["b"],
      prepped["w_fc"], prepped["b_fc"])

    # TODO(synk): for very large T*B (>> 64K rows) stream x over a second grid axis
    # instead of keeping whole (BB, T, I) blocks VMEM-resident (matters first on v7x's
    # 64 MiB VMEM); irrelevant at current sizes (~KBs).
    return out[:B]


def stock_price_lstm_ref(x, params):
    """Pure-JAX reference matching torch.nn.LSTM(batch_first=True) + Linear."""
    w_ih, w_hh, b_ih, b_hh, w_fc, b_fc = (
        params["w_ih"], params["w_hh"], params["b_ih"], params["b_hh"],
        params["w_fc"], params["b_fc"],
    )
    B, T, I = x.shape
    H = w_hh.shape[1]

    def step(carry, x_t):
        h, c = carry
        gates = x_t @ w_ih.T + h @ w_hh.T + b_ih + b_hh
        i_g = jax.nn.sigmoid(gates[:, 0 * H:1 * H])
        f_g = jax.nn.sigmoid(gates[:, 1 * H:2 * H])
        g_g = jnp.tanh(gates[:, 2 * H:3 * H])
        o_g = jax.nn.sigmoid(gates[:, 3 * H:4 * H])
        c_new = f_g * c + i_g * g_g
        h_new = o_g * jnp.tanh(c_new)
        return (h_new, c_new), None

    h0 = jnp.zeros((B, H), jnp.float32)
    c0 = jnp.zeros((B, H), jnp.float32)
    (h_T, _), _ = lax.scan(step, (h0, c0), jnp.transpose(x, (1, 0, 2)))
    return h_T @ w_fc.T + b_fc


def init_params(key, input_size, hidden_size, output_size):
    """Deterministic init mimicking PyTorch's U(-1/sqrt(H), 1/sqrt(H))."""
    ks = jax.random.split(key, 6)
    bound = 1.0 / jnp.sqrt(jnp.float32(hidden_size))
    u = lambda k, shape: jax.random.uniform(k, shape, jnp.float32, -bound, bound)
    return {
        "w_ih": u(ks[0], (4 * hidden_size, input_size)),
        "w_hh": u(ks[1], (4 * hidden_size, hidden_size)),
        "b_ih": u(ks[2], (4 * hidden_size,)),
        "b_hh": u(ks[3], (4 * hidden_size,)),
        "w_fc": u(ks[4], (output_size, hidden_size)),
        "b_fc": u(ks[5], (output_size,)),
    }


if __name__ == "__main__":
    # Pin matmul precision so the kernel and the f32 reference agree to 1e-5 on TPU
    # regardless of the default (bf16-pass) MXU precision.
    jax.config.update("jax_default_matmul_precision", "highest")

    B, T, INPUT_SIZE, HIDDEN_SIZE, OUTPUT_SIZE = 2, 8, 4, 32, 1

    key = jax.random.PRNGKey(0)
    k_x, k_x2, k_p = jax.random.split(key, 3)
    params = init_params(k_p, INPUT_SIZE, HIDDEN_SIZE, OUTPUT_SIZE)
    prepped = prepare_params(params)

    fwd = jax.jit(stock_price_lstm_pallas)

    # Small-shape check (module's nominal shapes).
    x = jax.random.normal(k_x, (B, T, INPUT_SIZE), jnp.float32)
    out = jax.block_until_ready(fwd(x, prepped))
    ref = jax.block_until_ready(stock_price_lstm_ref(x, params))
    assert out.shape == (B, OUTPUT_SIZE), out.shape
    assert jnp.allclose(out, ref, atol=1e-5, rtol=1e-5), (out, ref)

    # Larger batched launch: exercises the multi-block batch grid (and the
    # perf-review "batch many independent sequences per call" path).
    B2 = 16
    x2 = jax.random.normal(k_x2, (B2, T, INPUT_SIZE), jnp.float32)
    out2 = jax.block_until_ready(fwd(x2, prepped))
    ref2 = jax.block_until_ready(stock_price_lstm_ref(x2, params))
    assert out2.shape == (B2, OUTPUT_SIZE), out2.shape
    assert jnp.allclose(out2, ref2, atol=1e-5, rtol=1e-5), (out2, ref2)

    print("KERNEL_OK")
</pallas_src>

<mosaic_0001>
module attributes {stable_mosaic.version = 11 : i64} {
  func.func @lstm_fc_kernel(%arg0: i32, %arg1: memref<8x8x4xf32, #tpu.memory_space<vmem>>, %arg2: memref<4x128xf32, #tpu.memory_space<vmem>>, %arg3: memref<32x128xf32, #tpu.memory_space<vmem>>, %arg4: memref<1x128xf32, #tpu.memory_space<vmem>>, %arg5: memref<1x32xf32, #tpu.memory_space<vmem>>, %arg6: memref<1x1xf32, #tpu.memory_space<vmem>>, %arg7: memref<8x1xf32, #tpu.memory_space<vmem>>) attributes {dimension_semantics = [#tpu.dimension_semantics<parallel>], iteration_bounds = array<i64: 1>, scalar_prefetch = 0 : i64, scratch_operands = 0 : i64, tpu.core_type = #tpu.core_type<tc>, window_params = [{transform_indices = @transform_0, window_bounds = array<i64: 8, 8, 4>}, {pipeline_mode = #tpu.pipeline_mode<synchronous>, transform_indices = @transform_1, window_bounds = array<i64: 4, 128>}, {pipeline_mode = #tpu.pipeline_mode<synchronous>, transform_indices = @transform_2, window_bounds = array<i64: 32, 128>}, {pipeline_mode = #tpu.pipeline_mode<synchronous>, transform_indices = @transform_3, window_bounds = array<i64: 1, 128>}, {pipeline_mode = #tpu.pipeline_mode<synchronous>, transform_indices = @transform_4, window_bounds = array<i64: 1, 32>}, {pipeline_mode = #tpu.pipeline_mode<synchronous>, transform_indices = @transform_5, window_bounds = array<i64: 1, 1>}, {transform_indices = @transform_6, window_bounds = array<i64: 8, 1>}]} {
    %c0 = arith.constant 0 : index
    %c0_0 = arith.constant 0 : index
    %0 = vector.load %arg2[%c0, %c0_0] : memref<4x128xf32, #tpu.memory_space<vmem>>, vector<4x128xf32>
    %c0_1 = arith.constant 0 : index
    %c0_2 = arith.constant 0 : index
    %1 = vector.load %arg3[%c0_1, %c0_2] : memref<32x128xf32, #tpu.memory_space<vmem>>, vector<32x128xf32>
    %c0_3 = arith.constant 0 : index
    %c0_4 = arith.constant 0 : index
    %2 = vector.load %arg4[%c0_3, %c0_4] : memref<1x128xf32, #tpu.memory_space<vmem>>, vector<1x128xf32>
    %c0_5 = arith.constant 0 : index
    %c0_6 = arith.constant 0 : index
    %c0_7 = arith.constant 0 : index
    %3 = vector.load %arg1[%c0_5, %c0_6, %c0_7] : memref<8x8x4xf32, #tpu.memory_space<vmem>>, vector<8x1x4xf32>
    %4 = vector.shape_cast %3 : vector<8x1x4xf32> to vector<8x4xf32>
    %cst = arith.constant dense<0.000000e+00> : vector<8x128xf32>
    %5 = tpu.matmul %4, %0, %cst {dimension_numbers = #tpu.dot_dimension_numbers<[1], [0], [0], [1], [0, 0, 1, 1], [], []>, precision = #tpu.contract_precision<fp32>} : vector<8x4xf32>, vector<4x128xf32>, vector<8x128xf32> -> vector<8x128xf32>
    %6 = vector.broadcast %2 : vector<1x128xf32> to vector<8x128xf32>
    %7 = arith.addf %5, %6 : vector<8x128xf32>
    %c0_8 = arith.constant 0 : index
    %c1 = arith.constant 1 : index
    %c0_9 = arith.constant 0 : index
    %8 = vector.load %arg1[%c0_8, %c1, %c0_9] : memref<8x8x4xf32, #tpu.memory_space<vmem>>, vector<8x1x4xf32>
    %9 = vector.shape_cast %8 : vector<8x1x4xf32> to vector<8x4xf32>
    %cst_10 = arith.constant dense<0.000000e+00> : vector<8x128xf32>
    %10 = tpu.matmul %9, %0, %cst_10 {dimension_numbers = #tpu.dot_dimension_numbers<[1], [0], [0], [1], [0, 0, 1, 1], [], []>, precision = #tpu.contract_precision<fp32>} : vector<8x4xf32>, vector<4x128xf32>, vector<8x128xf32> -> vector<8x128xf32>
    %11 = vector.broadcast %2 : vector<1x128xf32> to vector<8x128xf32>
    %12 = arith.addf %10, %11 : vector<8x128xf32>
    %c0_11 = arith.constant 0 : index
    %c2 = arith.constant 2 : index
    %c0_12 = arith.constant 0 : index
    %13 = vector.load %arg1[%c0_11, %c2, %c0_12] : memref<8x8x4xf32, #tpu.memory_space<vmem>>, vector<8x1x4xf32>
    %14 = vector.shape_cast %13 : vector<8x1x4xf32> to vector<8x4xf32>
    %cst_13 = arith.constant dense<0.000000e+00> : vector<8x128xf32>
    %15 = tpu.matmul %14, %0, %cst_13 {dimension_numbers = #tpu.dot_dimension_numbers<[1], [0], [0], [1], [0, 0, 1, 1], [], []>, precision = #tpu.contract_precision<fp32>} : vector<8x4xf32>, vector<4x128xf32>, vector<8x128xf32> -> vector<8x128xf32>
    %16 = vector.broadcast %2 : vector<1x128xf32> to vector<8x128xf32>
    %17 = arith.addf %15, %16 : vector<8x128xf32>
    %c0_14 = arith.constant 0 : index
    %c3 = arith.constant 3 : index
    %c0_15 = arith.constant 0 : index
    %18 = vector.load %arg1[%c0_14, %c3, %c0_15] : memref<8x8x4xf32, #tpu.memory_space<vmem>>, vector<8x1x4xf32>
    %19 = vector.shape_cast %18 : vector<8x1x4xf32> to vector<8x4xf32>
    %cst_16 = arith.constant dense<0.000000e+00> : vector<8x128xf32>
    %20 = tpu.matmul %19, %0, %cst_16 {dimension_numbers = #tpu.dot_dimension_numbers<[1], [0], [0], [1], [0, 0, 1, 1], [], []>, precision = #tpu.contract_precision<fp32>} : vector<8x4xf32>, vector<4x128xf32>, vector<8x128xf32> -> vector<8x128xf32>
    %21 = vector.broadcast %2 : vector<1x128xf32> to vector<8x128xf32>
    %22 = arith.addf %20, %21 : vector<8x128xf32>
    %c0_17 = arith.constant 0 : index
    %c4 = arith.constant 4 : index
    %c0_18 = arith.constant 0 : index
    %23 = vector.load %arg1[%c0_17, %c4, %c0_18] : memref<8x8x4xf32, #tpu.memory_space<vmem>>, vector<8x1x4xf32>
    %24 = vector.shape_cast %23 : vector<8x1x4xf32> to vector<8x4xf32>
    %cst_19 = arith.constant dense<0.000000e+00> : vector<8x128xf32>
    %25 = tpu.matmul %24, %0, %cst_19 {dimension_numbers = #tpu.dot_dimension_numbers<[1], [0], [0], [1], [0, 0, 1, 1], [], []>, precision = #tpu.contract_precision<fp32>} : vector<8x4xf32>, vector<4x128xf32>, vector<8x128xf32> -> vector<8x128xf32>
    %26 = vector.broadcast %2 : vector<1x128xf32> to vector<8x128xf32>
    %27 = arith.addf %25, %26 : vector<8x128xf32>
    %c0_20 = arith.constant 0 : index
    %c5 = arith.constant 5 : index
    %c0_21 = arith.constant 0 : index
    %28 = vector.load %arg1[%c0_20, %c5, %c0_21] : memref<8x8x4xf32, #tpu.memory_space<vmem>>, vector<8x1x4xf32>
    %29 = vector.shape_cast %28 : vector<8x1x4xf32> to vector<8x4xf32>
    %cst_22 = arith.constant dense<0.000000e+00> : vector<8x128xf32>
    %30 = tpu.matmul %29, %0, %cst_22 {dimension_numbers = #tpu.dot_dimension_numbers<[1], [0], [0], [1], [0, 0, 1, 1], [], []>, precision = #tpu.contract_precision<fp32>} : vector<8x4xf32>, vector<4x128xf32>, vector<8x128xf32> -> vector<8x128xf32>
    %31 = vector.broadcast %2 : vector<1x128xf32> to vector<8x128xf32>
    %32 = arith.addf %30, %31 : vector<8x128xf32>
    %c0_23 = arith.constant 0 : index
    %c6 = arith.constant 6 : index
    %c0_24 = arith.constant 0 : index
    %33 = vector.load %arg1[%c0_23, %c6, %c0_24] : memref<8x8x4xf32, #tpu.memory_space<vmem>>, vector<8x1x4xf32>
    %34 = vector.shape_cast %33 : vector<8x1x4xf32> to vector<8x4xf32>
    %cst_25 = arith.constant dense<0.000000e+00> : vector<8x128xf32>
    %35 = tpu.matmul %34, %0, %cst_25 {dimension_numbers = #tpu.dot_dimension_numbers<[1], [0], [0], [1], [0, 0, 1, 1], [], []>, precision = #tpu.contract_precision<fp32>} : vector<8x4xf32>, vector<4x128xf32>, vector<8x128xf32> -> vector<8x128xf32>
    %36 = vector.broadcast %2 : vector<1x128xf32> to vector<8x128xf32>
    %37 = arith.addf %35, %36 : vector<8x128xf32>
    %c0_26 = arith.constant 0 : index
    %c7 = arith.constant 7 : index
    %c0_27 = arith.constant 0 : index
    %38 = vector.load %arg1[%c0_26, %c7, %c0_27] : memref<8x8x4xf32, #tpu.memory_space<vmem>>, vector<8x1x4xf32>
    %39 = vector.shape_cast %38 : vector<8x1x4xf32> to vector<8x4xf32>
    %cst_28 = arith.constant dense<0.000000e+00> : vector<8x128xf32>
    %40 = tpu.matmul %39, %0, %cst_28 {dimension_numbers = #tpu.dot_dimension_numbers<[1], [0], [0], [1], [0, 0, 1, 1], [], []>, precision = #tpu.contract_precision<fp32>} : vector<8x4xf32>, vector<4x128xf32>, vector<8x128xf32> -> vector<8x128xf32>
    %41 = vector.broadcast %2 : vector<1x128xf32> to vector<8x128xf32>
    %42 = arith.addf %40, %41 : vector<8x128xf32>
    %cst_29 = arith.constant 0.000000e+00 : f32
    %43 = vector.broadcast %cst_29 : f32 to vector<8x32xf32>
    %cst_30 = arith.constant 0.000000e+00 : f32
    %44 = vector.broadcast %cst_30 : f32 to vector<8x32xf32>
    %cst_31 = arith.constant dense<0.000000e+00> : vector<8x128xf32>
    %45 = tpu.matmul %43, %1, %cst_31 {dimension_numbers = #tpu.dot_dimension_numbers<[1], [0], [0], [1], [0, 0, 1, 1], [], []>, precision = #tpu.contract_precision<fp32>} : vector<8x32xf32>, vector<32x128xf32>, vector<8x128xf32> -> vector<8x128xf32>
    %46 = arith.addf %7, %45 : vector<8x128xf32>
    %47 = arith.negf %46 : vector<8x128xf32>
    %48 = math.exp %47 : vector<8x128xf32>
    %cst_32 = arith.constant 1.000000e+00 : f32
    %49 = vector.broadcast %cst_32 : f32 to vector<8x128xf32>
    %50 = arith.addf %49, %48 : vector<8x128xf32>
    %51 = arith.divf %49, %50 : vector<8x128xf32>
    %52 = math.tanh %46 : vector<8x128xf32>
    %53 = vector.extract_strided_slice %51 {offsets = [0, 0], sizes = [8, 32], strides = [1, 1]} : vector<8x128xf32> to vector<8x32xf32>
    %54 = vector.extract_strided_slice %51 {offsets = [0, 32], sizes = [8, 32], strides = [1, 1]} : vector<8x128xf32> to vector<8x32xf32>
    %55 = vector.extract_strided_slice %52 {offsets = [0, 64], sizes = [8, 32], strides = [1, 1]} : vector<8x128xf32> to vector<8x32xf32>
    %56 = vector.extract_strided_slice %51 {offsets = [0, 96], sizes = [8, 32], strides = [1, 1]} : vector<8x128xf32> to vector<8x32xf32>
    %57 = arith.mulf %54, %44 : vector<8x32xf32>
    %58 = arith.mulf %53, %55 : vector<8x32xf32>
    %59 = arith.addf %57, %58 : vector<8x32xf32>
    %60 = math.tanh %59 : vector<8x32xf32>
    %61 = arith.mulf %56, %60 : vector<8x32xf32>
    %cst_33 = arith.constant dense<0.000000e+00> : vector<8x128xf32>
    %62 = tpu.matmul %61, %1, %cst_33 {dimension_numbers = #tpu.dot_dimension_numbers<[1], [0], [0], [1], [0, 0, 1, 1], [], []>, precision = #tpu.contract_precision<fp32>} : vector<8x32xf32>, vector<32x128xf32>, vector<8x128xf32> -> vector<8x128xf32>
    %63 = arith.addf %12, %62 : vector<8x128xf32>
    %64 = arith.negf %63 : vector<8x128xf32>
    %65 = math.exp %64 : vector<8x128xf32>
    %cst_34 = arith.constant 1.000000e+00 : f32
    %66 = vector.broadcast %cst_34 : f32 to vector<8x128xf32>
    %67 = arith.addf %66, %65 : vector<8x128xf32>
    %68 = arith.divf %66, %67 : vector<8x128xf32>
    %69 = math.tanh %63 : vector<8x128xf32>
    %70 = vector.extract_strided_slice %68 {offsets = [0, 0], sizes = [8, 32], strides = [1, 1]} : vector<8x128xf32> to vector<8x32xf32>
    %71 = vector.extract_strided_slice %68 {offsets = [0, 32], sizes = [8, 32], strides = [1, 1]} : vector<8x128xf32> to vector<8x32xf32>
    %72 = vector.extract_strided_slice %69 {offsets = [0, 64], sizes = [8, 32], strides = [1, 1]} : vector<8x128xf32> to vector<8x32xf32>
    %73 = vector.extract_strided_slice %68 {offsets = [0, 96], sizes = [8, 32], strides = [1, 1]} : vector<8x128xf32> to vector<8x32xf32>
    %74 = arith.mulf %71, %59 : vector<8x32xf32>
    %75 = arith.mulf %70, %72 : vector<8x32xf32>
    %76 = arith.addf %74, %75 : vector<8x32xf32>
    %77 = math.tanh %76 : vector<8x32xf32>
    %78 = arith.mulf %73, %77 : vector<8x32xf32>
    %cst_35 = arith.constant dense<0.000000e+00> : vector<8x128xf32>
    %79 = tpu.matmul %78, %1, %cst_35 {dimension_numbers = #tpu.dot_dimension_numbers<[1], [0], [0], [1], [0, 0, 1, 1], [], []>, precision = #tpu.contract_precision<fp32>} : vector<8x32xf32>, vector<32x128xf32>, vector<8x128xf32> -> vector<8x128xf32>
    %80 = arith.addf %17, %79 : vector<8x128xf32>
    %81 = arith.negf %80 : vector<8x128xf32>
    %82 = math.exp %81 : vector<8x128xf32>
    %cst_36 = arith.constant 1.000000e+00 : f32
    %83 = vector.broadcast %cst_36 : f32 to vector<8x128xf32>
    %84 = arith.addf %83, %82 : vector<8x128xf32>
    %85 = arith.divf %83, %84 : vector<8x128xf32>
    %86 = math.tanh %80 : vector<8x128xf32>
    %87 = vector.extract_strided_slice %85 {offsets = [0, 0], sizes = [8, 32], strides = [1, 1]} : vector<8x128xf32> to vector<8x32xf32>
    %88 = vector.extract_strided_slice %85 {offsets = [0, 32], sizes = [8, 32], strides = [1, 1]} : vector<8x128xf32> to vector<8x32xf32>
    %89 = vector.extract_strided_slice %86 {offsets = [0, 64], sizes = [8, 32], strides = [1, 1]} : vector<8x128xf32> to vector<8x32xf32>
    %90 = vector.extract_strided_slice %85 {offsets = [0, 96], sizes = [8, 32], strides = [1, 1]} : vector<8x128xf32> to vector<8x32xf32>
    %91 = arith.mulf %88, %76 : vector<8x32xf32>
    %92 = arith.mulf %87, %89 : vector<8x32xf32>
    %93 = arith.addf %91, %92 : vector<8x32xf32>
    %94 = math.tanh %93 : vector<8x32xf32>
    %95 = arith.mulf %90, %94 : vector<8x32xf32>
    %cst_37 = arith.constant dense<0.000000e+00> : vector<8x128xf32>
    %96 = tpu.matmul %95, %1, %cst_37 {dimension_numbers = #tpu.dot_dimension_numbers<[1], [0], [0], [1], [0, 0, 1, 1], [], []>, precision = #tpu.contract_precision<fp32>} : vector<8x32xf32>, vector<32x128xf32>, vector<8x128xf32> -> vector<8x128xf32>
    %97 = arith.addf %22, %96 : vector<8x128xf32>
    %98 = arith.negf %97 : vector<8x128xf32>
    %99 = math.exp %98 : vector<8x128xf32>
    %cst_38 = arith.constant 1.000000e+00 : f32
    %100 = vector.broadcast %cst_38 : f32 to vector<8x128xf32>
    %101 = arith.addf %100, %99 : vector<8x128xf32>
    %102 = arith.divf %100, %101 : vector<8x128xf32>
    %103 = math.tanh %97 : vector<8x128xf32>
    %104 = vector.extract_strided_slice %102 {offsets = [0, 0], sizes = [8, 32], strides = [1, 1]} : vector<8x128xf32> to vector<8x32xf32>
    %105 = vector.extract_strided_slice %102 {offsets = [0, 32], sizes = [8, 32], strides = [1, 1]} : vector<8x128xf32> to vector<8x32xf32>
    %106 = vector.extract_strided_slice %103 {offsets = [0, 64], sizes = [8, 32], strides = [1, 1]} : vector<8x128xf32> to vector<8x32xf32>
    %107 = vector.extract_strided_slice %102 {offsets = [0, 96], sizes = [8, 32], strides = [1, 1]} : vector<8x128xf32> to vector<8x32xf32>
    %108 = arith.mulf %105, %93 : vector<8x32xf32>
    %109 = arith.mulf %104, %106 : vector<8x32xf32>
    %110 = arith.addf %108, %109 : vector<8x32xf32>
    %111 = math.tanh %110 : vector<8x32xf32>
    %112 = arith.mulf %107, %111 : vector<8x32xf32>
    %cst_39 = arith.constant dense<0.000000e+00> : vector<8x128xf32>
    %113 = tpu.matmul %112, %1, %cst_39 {dimension_numbers = #tpu.dot_dimension_numbers<[1], [0], [0], [1], [0, 0, 1, 1], [], []>, precision = #tpu.contract_precision<fp32>} : vector<8x32xf32>, vector<32x128xf32>, vector<8x128xf32> -> vector<8x128xf32>
    %114 = arith.addf %27, %113 : vector<8x128xf32>
    %115 = arith.negf %114 : vector<8x128xf32>
    %116 = math.exp %115 : vector<8x128xf32>
    %cst_40 = arith.constant 1.000000e+00 : f32
    %117 = vector.broadcast %cst_40 : f32 to vector<8x128xf32>
    %118 = arith.addf %117, %116 : vector<8x128xf32>
    %119 = arith.divf %117, %118 : vector<8x128xf32>
    %120 = math.tanh %114 : vector<8x128xf32>
    %121 = vector.extract_strided_slice %119 {offsets = [0, 0], sizes = [8, 32], strides = [1, 1]} : vector<8x128xf32> to vector<8x32xf32>
    %122 = vector.extract_strided_slice %119 {offsets = [0, 32], sizes = [8, 32], strides = [1, 1]} : vector<8x128xf32> to vector<8x32xf32>
    %123 = vector.extract_strided_slice %120 {offsets = [0, 64], sizes = [8, 32], strides = [1, 1]} : vector<8x128xf32> to vector<8x32xf32>
    %124 = vector.extract_strided_slice %119 {offsets = [0, 96], sizes = [8, 32], strides = [1, 1]} : vector<8x128xf32> to vector<8x32xf32>
    %125 = arith.mulf %122, %110 : vector<8x32xf32>
    %126 = arith.mulf %121, %123 : vector<8x32xf32>
    %127 = arith.addf %125, %126 : vector<8x32xf32>
    %128 = math.tanh %127 : vector<8x32xf32>
    %129 = arith.mulf %124, %128 : vector<8x32xf32>
    %cst_41 = arith.constant dense<0.000000e+00> : vector<8x128xf32>
    %130 = tpu.matmul %129, %1, %cst_41 {dimension_numbers = #tpu.dot_dimension_numbers<[1], [0], [0], [1], [0, 0, 1, 1], [], []>, precision = #tpu.contract_precision<fp32>} : vector<8x32xf32>, vector<32x128xf32>, vector<8x128xf32> -> vector<8x128xf32>
    %131 = arith.addf %32, %130 : vector<8x128xf32>
    %132 = arith.negf %131 : vector<8x128xf32>
    %133 = math.exp %132 : vector<8x128xf32>
    %cst_42 = arith.constant 1.000000e+00 : f32
    %134 = vector.broadcast %cst_42 : f32 to vector<8x128xf32>
    %135 = arith.addf %134, %133 : vector<8x128xf32>
    %136 = arith.divf %134, %135 : vector<8x128xf32>
    %137 = math.tanh %131 : vector<8x128xf32>
    %138 = vector.extract_strided_slice %136 {offsets = [0, 0], sizes = [8, 32], strides = [1, 1]} : vector<8x128xf32> to vector<8x32xf32>
    %139 = vector.extract_strided_slice %136 {offsets = [0, 32], sizes = [8, 32], strides = [1, 1]} : vector<8x128xf32> to vector<8x32xf32>
    %140 = vector.extract_strided_slice %137 {offsets = [0, 64], sizes = [8, 32], strides = [1, 1]} : vector<8x128xf32> to vector<8x32xf32>
    %141 = vector.extract_strided_slice %136 {offsets = [0, 96], sizes = [8, 32], strides = [1, 1]} : vector<8x128xf32> to vector<8x32xf32>
    %142 = arith.mulf %139, %127 : vector<8x32xf32>
    %143 = arith.mulf %138, %140 : vector<8x32xf32>
    %144 = arith.addf %142, %143 : vector<8x32xf32>
    %145 = math.tanh %144 : vector<8x32xf32>
    %146 = arith.mulf %141, %145 : vector<8x32xf32>
    %cst_43 = arith.constant dense<0.000000e+00> : vector<8x128xf32>
    %147 = tpu.matmul %146, %1, %cst_43 {dimension_numbers = #tpu.dot_dimension_numbers<[1], [0], [0], [1], [0, 0, 1, 1], [], []>, precision = #tpu.contract_precision<fp32>} : vector<8x32xf32>, vector<32x128xf32>, vector<8x128xf32> -> vector<8x128xf32>
    %148 = arith.addf %37, %147 : vector<8x128xf32>
    %149 = arith.negf %148 : vector<8x128xf32>
    %150 = math.exp %149 : vector<8x128xf32>
    %cst_44 = arith.constant 1.000000e+00 : f32
    %151 = vector.broadcast %cst_44 : f32 to vector<8x128xf32>
    %152 = arith.addf %151, %150 : vector<8x128xf32>
    %153 = arith.divf %151, %152 : vector<8x128xf32>
    %154 = math.tanh %148 : vector<8x128xf32>
    %155 = vector.extract_strided_slice %153 {offsets = [0, 0], sizes = [8, 32], strides = [1, 1]} : vector<8x128xf32> to vector<8x32xf32>
    %156 = vector.extract_strided_slice %153 {offsets = [0, 32], sizes = [8, 32], strides = [1, 1]} : vector<8x128xf32> to vector<8x32xf32>
    %157 = vector.extract_strided_slice %154 {offsets = [0, 64], sizes = [8, 32], strides = [1, 1]} : vector<8x128xf32> to vector<8x32xf32>
    %158 = vector.extract_strided_slice %153 {offsets = [0, 96], sizes = [8, 32], strides = [1, 1]} : vector<8x128xf32> to vector<8x32xf32>
    %159 = arith.mulf %156, %144 : vector<8x32xf32>
    %160 = arith.mulf %155, %157 : vector<8x32xf32>
    %161 = arith.addf %159, %160 : vector<8x32xf32>
    %162 = math.tanh %161 : vector<8x32xf32>
    %163 = arith.mulf %158, %162 : vector<8x32xf32>
    %cst_45 = arith.constant dense<0.000000e+00> : vector<8x128xf32>
    %164 = tpu.matmul %163, %1, %cst_45 {dimension_numbers = #tpu.dot_dimension_numbers<[1], [0], [0], [1], [0, 0, 1, 1], [], []>, precision = #tpu.contract_precision<fp32>} : vector<8x32xf32>, vector<32x128xf32>, vector<8x128xf32> -> vector<8x128xf32>
    %165 = arith.addf %42, %164 : vector<8x128xf32>
    %166 = arith.negf %165 : vector<8x128xf32>
    %167 = math.exp %166 : vector<8x128xf32>
    %cst_46 = arith.constant 1.000000e+00 : f32
    %168 = vector.broadcast %cst_46 : f32 to vector<8x128xf32>
    %169 = arith.addf %168, %167 : vector<8x128xf32>
    %170 = arith.divf %168, %169 : vector<8x128xf32>
    %171 = math.tanh %165 : vector<8x128xf32>
    %172 = vector.extract_strided_slice %170 {offsets = [0, 0], sizes = [8, 32], strides = [1, 1]} : vector<8x128xf32> to vector<8x32xf32>
    %173 = vector.extract_strided_slice %170 {offsets = [0, 32], sizes = [8, 32], strides = [1, 1]} : vector<8x128xf32> to vector<8x32xf32>
    %174 = vector.extract_strided_slice %171 {offsets = [0, 64], sizes = [8, 32], strides = [1, 1]} : vector<8x128xf32> to vector<8x32xf32>
    %175 = vector.extract_strided_slice %170 {offsets = [0, 96], sizes = [8, 32], strides = [1, 1]} : vector<8x128xf32> to vector<8x32xf32>
    %176 = arith.mulf %173, %161 : vector<8x32xf32>
    %177 = arith.mulf %172, %174 : vector<8x32xf32>
    %178 = arith.addf %176, %177 : vector<8x32xf32>
    %179 = math.tanh %178 : vector<8x32xf32>
    %180 = arith.mulf %175, %179 : vector<8x32xf32>
    %c0_47 = arith.constant 0 : index
    %c0_48 = arith.constant 0 : index
    %181 = vector.load %arg5[%c0_47, %c0_48] : memref<1x32xf32, #tpu.memory_space<vmem>>, vector<1x32xf32>
    %c0_49 = arith.constant 0 : index
    %c0_50 = arith.constant 0 : index
    %182 = vector.load %arg6[%c0_49, %c0_50] : memref<1x1xf32, #tpu.memory_space<vmem>>, vector<1x1xf32>
    %183 = vector.broadcast %181 : vector<1x32xf32> to vector<8x32xf32>
    %184 = arith.mulf %180, %183 : vector<8x32xf32>
    %cst_51 = arith.constant dense<0.000000e+00> : vector<8xf32>
    %185 = vector.multi_reduction <add>, %184, %cst_51 [1] : vector<8x32xf32> to vector<8xf32>
    %186 = vector.shape_cast %185 : vector<8xf32> to vector<8x1xf32>
    %187 = vector.broadcast %182 : vector<1x1xf32> to vector<8x1xf32>
    %188 = arith.addf %186, %187 : vector<8x1xf32>
    %c0_52 = arith.constant 0 : index
    %c0_53 = arith.constant 0 : index
    %189 = vector.load %arg7[%c0_52, %c0_53] : memref<8x1xf32, #tpu.memory_space<vmem>>, vector<8x1xf32>
    tpu.vector_store %arg7[%c0_52, %c0_53], %188 {strides = array<i32>} : memref<8x1xf32, #tpu.memory_space<vmem>>, vector<8x1xf32>,
    return
  }
  func.func @transform_0(%arg0: i32) -> (i32, i32, i32) {
    %c0_i32 = arith.constant 0 : i32
    %c0_i32_0 = arith.constant 0 : i32
    %c0_i32_1 = arith.constant 0 : i32
    return %arg0, %c0_i32, %c0_i32_0 : i32, i32, i32
  }
  func.func @transform_1(%arg0: i32) -> (i32, i32) {
    %c0_i32 = arith.constant 0 : i32
    %c0_i32_0 = arith.constant 0 : i32
    %c0_i32_1 = arith.constant 0 : i32
    return %c0_i32, %c0_i32_0 : i32, i32
  }
  func.func @transform_2(%arg0: i32) -> (i32, i32) {
    %c0_i32 = arith.constant 0 : i32
    %c0_i32_0 = arith.constant 0 : i32
    %c0_i32_1 = arith.constant 0 : i32
    return %c0_i32, %c0_i32_0 : i32, i32
  }
  func.func @transform_3(%arg0: i32) -> (i32, i32) {
    %c0_i32 = arith.constant 0 : i32
    %c0_i32_0 = arith.constant 0 : i32
    %c0_i32_1 = arith.constant 0 : i32
    return %c0_i32, %c0_i32_0 : i32, i32
  }
  func.func @transform_4(%arg0: i32) -> (i32, i32) {
    %c0_i32 = arith.constant 0 : i32
    %c0_i32_0 = arith.constant 0 : i32
    %c0_i32_1 = arith.constant 0 : i32
    return %c0_i32, %c0_i32_0 : i32, i32
  }
  func.func @transform_5(%arg0: i32) -> (i32, i32) {
    %c0_i32 = arith.constant 0 : i32
    %c0_i32_0 = arith.constant 0 : i32
    %c0_i32_1 = arith.constant 0 : i32
    return %c0_i32, %c0_i32_0 : i32, i32
  }
  func.func @transform_6(%arg0: i32) -> (i32, i32) {
    %c0_i32 = arith.constant 0 : i32
    %c0_i32_0 = arith.constant 0 : i32
    return %arg0, %c0_i32 : i32, i32
  }
}

</mosaic_0001>

<bundles_post_ra>
// kernel: stock_price_lstm_pallas.1
= control target key start
LH: loop header
LB: loop body
LE: loop exit
PB: predicated region body
PF: predicated region fallthrough
CT: control target
= control target key end

     0   :  { %vm77_vm0 = vcmask 1043456   ;;  %vm54_vm1 = vcmask 1041409   ;;  %v9207_v0 = vmov 0.0   ;;  %vm9208_vm2 = vmmov 0   ;;  %s9210_s9 = smov 32   ;;  %s9211_s12 = smov 96   ;;  %s10464_s1 = inlined_call_operand.vmem [shape: f32[4,128], index: 1, kind: input, shape index: {}]   ;;  %s10465_s0 = inlined_call_operand.vmem [shape: f32[8,8,4], index: 0, kind: input, shape index: {}]   ;;  %s10466_s2 = inlined_call_operand.vmem [shape: f32[32,128], index: 2, kind: input, shape index: {}]   ;;  %s10467_s3 = inlined_call_operand.vmem [shape: f32[1,128], index: 3, kind: input, shape index: {}]   ;;  %s10468_s4 = inlined_call_operand.vmem [shape: f32[1,32], index: 4, kind: input, shape index: {}]   ;;  %s10469_s5 = inlined_call_operand.<no memory space> [shape: f32[1,1], index: 5, kind: input, shape index: {}]   ;;  %s10470_s6 = inlined_call_operand.vmem [shape: f32[8,1], index: 6, kind: output, shape index: {}]  }
   0x1   :  { %8370 = vmatprep.subr.mxu0 %v9207_v0  ;;  %v25_v1 = vld [vmem:[%s10464_s1] sm:$0xf]  ;;  %8375 = vmatprep.subr.mxu1 %v9207_v0  ;;  %v32_v3 = vld [vmem:[%s10465_s0 + $0x8] sm:$0x1]  ;;  %v33_v5 = vld [vmem:[%s10465_s0 + $0x10] sm:$0x1] }
   0x2   :  { %v31_v2 = vld [vmem:[%s10465_s0] sm:$0x1]  ;;  %v79_v4 = vsel %vm77_vm0, %v25_v1, 0  ;;  %8372 = vmatprep.mubr.msk.f32.mxu0 %vm9208_vm2, %v9207_v0  ;;  %8377 = vmatprep.mubr.msk.f32.mxu1 %vm9208_vm2, %v9207_v0  ;;  %v34_v6 = vld [vmem:[%s10465_s0 + $0x18] sm:$0x1]  ;;  %v53_v7 = vrot.slane %v32_v3, 7 }
   0x3   :  { %v9268_v8 = vand.u32 4294901760, %v79_v4  ;;  %v35_v9 = vld [vmem:[%s10465_s0 + $0x20] sm:$0x1]  ;;  %v36_v10 = vld [vmem:[%s10465_s0 + $0x28] sm:$0x1]  ;;  %v56_v11 = vrot.slane %v33_v5, 6 }
   0x4   :  { %v37_v12 = vld [vmem:[%s10465_s0 + $0x30] sm:$0x1]  ;;  %v55_v13 = vsel %vm54_vm1, %v53_v7, %v31_v2  ;;  %vm57_vm3 = vcmask 1042434   ;;  %v59_v14 = vrot.slane %v34_v6, 5  ;;  %v38_v16 = vld [vmem:[%s10465_s0 + $0x38] sm:$0x1] }
   0x5   :  { %8371 = vmatpush3.msra.mxu0 %v9268_v8  ;;  %v9282_v15 = vsub.f32 %v79_v4, %v9268_v8  ;;  %v58_v17 = vsel %vm57_vm3, %v56_v11, %v55_v13  ;;  %vm60_vm4 = vcmask 1043459   ;;  %v62_v18 = vrot.slane %v35_v9, 4  ;;  %v528_v19 = vld [vmem:[%s10465_s0 + $0x9] sm:$0x1]  ;;  %v529_v22 = vld [vmem:[%s10465_s0 + $0x11] sm:$0x1] }
   0x6   :  { %8380 = vmatprep.subr.mxu0 %v9207_v0  ;;  %v61_v20 = vsel %vm60_vm4, %v59_v14, %v58_v17  ;;  %vm63_vm5 = vcmask 1044484   ;;  %v65_v21 = vrot.slane %v36_v10, 3  ;;  %vm66_vm6 = vcmask 1045509   ;;  %v527_v26 = vld [vmem:[%s10465_s0 + $0x1] sm:$0x1] }
   0x7   :  { %v9297_v23 = vand.u32 4294901760, %v9282_v15  ;;  %v64_v24 = vsel %vm63_vm5, %v62_v18, %v61_v20  ;;  %v68_v25 = vrot.slane %v37_v12, 2  ;;  %vm69_vm7 = vcmask 1046534   ;;  %v530_v27 = vld [vmem:[%s10465_s0 + $0x19] sm:$0x1] }
   0x8   :  { %v67_v28 = vsel %vm66_vm6, %v65_v21, %v64_v24  ;;  %v71_v29 = vrot.slane %v38_v16, 1  ;;  %vm72_vm8 = vcmask 1047559   ;;  %vm74_vm9 = vcmask 31744   ;;  %v531_v30 = vld [vmem:[%s10465_s0 + $0x21] sm:$0x1] }
   0x9   :  { %v191_v31 = vsub.f32 %v9282_v15, %v9297_v23  ;;  %v70_v32 = vsel %vm69_vm7, %v68_v25, %v67_v28  ;;  %v532_v33 = vld [vmem:[%s10465_s0 + $0x29] sm:$0x1]  ;;  %v533_v34 = vld [vmem:[%s10465_s0 + $0x31] sm:$0x1]  ;;  %v534_v35 = vld [vmem:[%s10465_s0 + $0x39] sm:$0x1] }
   0xa   :  { %v73_v36 = vsel %vm72_vm8, %v71_v29, %v70_v32  ;;  %v543_v37 = vrot.slane %v528_v19, 7  ;;  %v545_v38 = vrot.slane %v529_v22, 6  ;;  %v547_v39 = vrot.slane %v530_v27, 5  ;;  %v1005_v44 = vld [vmem:[%s10465_s0 + $0x2] sm:$0x1] }
   0xb   :  { %v9323_v40 = vand.u32 4294901760, %v191_v31  ;;  %v75_v41 = vsel %vm74_vm9, %v73_v36, 0  ;;  %v549_v42 = vrot.slane %v531_v30, 4  ;;  %v551_v43 = vrot.slane %v532_v33, 3  ;;  %v1006_v45 = vld [vmem:[%s10465_s0 + $0xa] sm:$0x1] }
   0xc   :  { %v9332_v46 = vand.u32 4294901760, %v75_v41  ;;  %v544_v47 = vsel %vm54_vm1, %v543_v37, %v527_v26  ;;  %v553_v48 = vrot.slane %v533_v34, 2  ;;  %v555_v49 = vrot.slane %v534_v35, 1  ;;  %v1007_v50 = vld [vmem:[%s10465_s0 + $0x12] sm:$0x1] }
   0xd   :  { %8376 = vmatpush3.msra.mxu1 %v9323_v40  ;;  %v546_v51 = vsel %vm57_vm3, %v545_v38, %v544_v47  ;;  %v1008_v52 = vld [vmem:[%s10465_s0 + $0x1a] sm:$0x1]  ;;  %v1009_v53 = vld [vmem:[%s10465_s0 + $0x22] sm:$0x1]  ;;  %v1010_v54 = vld [vmem:[%s10465_s0 + $0x2a] sm:$0x1] }
   0xe   :  { %v9350_v55 = vsub.f32 %v75_v41, %v9332_v46  ;;  %8378 = vmatmul.mubr.f32.vlgmr.msra.gmra.mxu1 %v9332_v46  ;;  %8385 = vmatprep.subr.mxu1 %v9207_v0  ;;  %v548_v56 = vsel %vm60_vm4, %v547_v39, %v546_v51  ;;  %v1011_v57 = vld [vmem:[%s10465_s0 + $0x32] sm:$0x1]  ;;  %v1021_v58 = vrot.slane %v1006_v45, 7  ;;  %v1023_v59 = vrot.slane %v1007_v50, 6  ;;  %v1012_v61 = vld [vmem:[%s10465_s0 + $0x3a] sm:$0x1] }
   0xf   :  { %8386 = vmatpush3.msra.mxu1 %v9268_v8  ;;  %8387 = vmatprep.mubr.msk.f32.mxu1 %vm9208_vm2, %v9207_v0  ;;  %v550_v60 = vsel %vm63_vm5, %v549_v42, %v548_v56  ;;  %v1025_v62 = vrot.slane %v1008_v52, 5  ;;  %v1027_v63 = vrot.slane %v1009_v53, 4  ;;  %v1483_v1 = vld [vmem:[%s10465_s0 + $0x3] sm:$0x1]  ;;  %v1029_v5 = vrot.slane %v1010_v54, 3 }
  0x10   :  { %v149_v2 = vand.u32 4294901760, %v9350_v55  ;;  %8395 = vmatprep.subr.mxu1 %v9207_v0  ;;  %v552_v3 = vsel %vm66_vm6, %v551_v43, %v550_v60  ;;  %v1022_v4 = vsel %vm54_vm1, %v1021_v58, %v1005_v44  ;;  %v1484_v6 = vld [vmem:[%s10465_s0 + $0xb] sm:$0x1]  ;;  %v1485_v7 = vld [vmem:[%s10465_s0 + $0x13] sm:$0x1]  ;;  %v1031_v11 = vrot.slane %v1011_v57, 2 }
  0x11   :  { %v554_v9 = vsel %vm69_vm7, %v553_v48, %v552_v3  ;;  %v1024_v10 = vsel %vm57_vm3, %v1023_v59, %v1022_v4  ;;  %v1486_v12 = vld [vmem:[%s10465_s0 + $0x1b] sm:$0x1]  ;;  %v1499_v13 = vrot.slane %v1484_v6, 7  ;;  %v1033_v18 = vrot.slane %v1012_v61, 1  ;;  %v1487_v19 = vld [vmem:[%s10465_s0 + $0x23] sm:$0x1] }
  0x12   :  { %v150_v14 = vsub.f32 %v9350_v55, %v149_v2  ;;  %8388 = vmatmul.mubr.f32.vlgmr.msra.gmra.mxu1 %v149_v2  ;;  %v556_v16 = vsel %vm72_vm8, %v555_v49, %v554_v9  ;;  %v1026_v17 = vsel %vm60_vm4, %v1025_v62, %v1024_v10  ;;  %v1488_v20 = vld [vmem:[%s10465_s0 + $0x2b] sm:$0x1]  ;;  %v1489_v24 = vld [vmem:[%s10465_s0 + $0x33] sm:$0x1]  ;;  %v1501_v26 = vrot.slane %v1485_v7, 6 }
  0x13   :  { %8396 = vmatpush3.msra.mxu1 %v9268_v8  ;;  %8397 = vmatprep.mubr.msk.f32.mxu1 %vm9208_vm2, %v9207_v0  ;;  %v557_v21 = vsel %vm74_vm9, %v556_v16, 0  ;;  %v1028_v22 = vsel %vm63_vm5, %v1027_v63, %v1026_v17  ;;  %v1500_v25 = vsel %vm54_vm1, %v1499_v13, %v1483_v1  ;;  %v1503_v30 = vrot.slane %v1486_v12, 5  ;;  %v1962_v31 = vld [vmem:[%s10465_s0 + $0xc] sm:$0x1]  ;;  %v1490_v33 = vld [vmem:[%s10465_s0 + $0x3b] sm:$0x1] }
  0x14   :  { %v151_v27 = vand.u32 4294901760, %v150_v14  ;;  %8405 = vmatprep.subr.mxu1 %v9207_v0  ;;  %v9402_v28 = vand.u32 4294901760, %v557_v21  ;;  %v1030_v29 = vsel %vm66_vm6, %v1029_v5, %v1028_v22  ;;  %v1502_v34 = vsel %vm57_vm3, %v1501_v26, %v1500_v25  ;;  %v1963_v37 = vld [vmem:[%s10465_s0 + $0x14] sm:$0x1]  ;;  %v1961_v43 = vld [vmem:[%s10465_s0 + $0x4] sm:$0x1] }
  0x15   :  { %v1032_v32 = vsel %vm69_vm7, %v1031_v11, %v1030_v29  ;;  %v1505_v35 = vrot.slane %v1487_v19, 4  ;;  %v1507_v36 = vrot.slane %v1488_v20, 3  ;;  %v1504_v41 = vsel %vm60_vm4, %v1503_v30, %v1502_v34  ;;  %v1964_v51 = vld [vmem:[%s10465_s0 + $0x1c] sm:$0x1]  ;;  %v1965_v58 = vld [vmem:[%s10465_s0 + $0x24] sm:$0x1] }
  0x16   :  { %8373 = vmatmul.mubr.f32.vlgmr.msra.gmra.mxu0 %v151_v27  ;;  %8398 = vmatmul.mubr.f32.vlgmr.msra.gmra.mxu1 %v9332_v46  ;;  %v9418_v38 = vsub.f32 %v557_v21, %v9402_v28  ;;  %v1034_v39 = vsel %vm72_vm8, %v1033_v18, %v1032_v32  ;;  %v1509_v42 = vrot.slane %v1489_v24, 2  ;;  %v1977_v47 = vrot.slane %v1962_v31, 7  ;;  %v1966_v62 = vld [vmem:[%s10465_s0 + $0x2c] sm:$0x1]  ;;  %v9469_v63 = vld [vmem:[%s10465_s0 + $0x34] sm:$0x1] }
  0x17   :  { %8381 = vmatpush3.msra.mxu0 %v9282_v15  ;;  %8382 = vmatprep.mubr.msk.f32.mxu0 %vm9208_vm2, %v9207_v0  ;;  %v1035_v44 = vsel %vm74_vm9, %v1034_v39, 0  ;;  %v1506_v45 = vsel %vm63_vm5, %v1505_v35, %v1504_v41  ;;  %v1511_v50 = vrot.slane %v1490_v33, 1  ;;  %v1979_v52 = vrot.slane %v1963_v37, 6  ;;  %v9475_v2 = vld [vmem:[%s10465_s0 + $0x3c] sm:$0x1] }
  0x18   :  { %8390 = vmatprep.subr.mxu0 %v9207_v0  ;;  %8406 = vmatpush3.msra.mxu1 %v9323_v40  ;;  %v627_v48 = vand.u32 4294901760, %v9418_v38  ;;  %v1508_v49 = vsel %vm66_vm6, %v1507_v36, %v1506_v45  ;;  %v9440_v53 = vand.u32 4294901760, %v1035_v44  ;;  %v1978_v56 = vsel %vm54_vm1, %v1977_v47, %v1961_v43  ;;  %v2440_v4 = vld [vmem:[%s10465_s0 + $0xd] sm:$0x1]  ;;  %v9488_v6 = vld [vmem:[%s10465_s0 + $0x15] sm:$0x1] }
  0x19   :  { %8407 = vmatprep.mubr.msk.f32.mxu1 %vm9208_vm2, %v9207_v0  ;;  %8415 = vmatprep.subr.mxu1 %v9207_v0  ;;  %v1510_v54 = vsel %vm69_vm7, %v1509_v42, %v1508_v49  ;;  %v1981_v59 = vrot.slane %v1964_v51, 5  ;;  %v1980_v60 = vsel %vm57_vm3, %v1979_v52, %v1978_v56  ;;  %v1983_v3 = vrot.slane %v1965_v58, 4  ;;  %v9493_v7 = vld [vmem:[%s10465_s0 + $0x1d] sm:$0x1]  ;;  %v2918_v9 = vld [vmem:[%s10465_s0 + $0xe] sm:$0x1] }
  0x1a   :  { %8383 = vmatmul.mubr.f32.vlgmr.msra.gmra.mxu0 %v9350_v55  ;;  %v628_v57 = vsub.f32 %v9418_v38, %v627_v48  ;;  %8408 = vmatmul.mubr.f32.vlgmr.msra.gmra.mxu1 %v9402_v28  ;;  %v1512_v55 = vsel %vm72_vm8, %v1511_v50, %v1510_v54  ;;  %v9461_v61 = vsub.f32 %v1035_v44, %v9440_v53  ;;  %v2919_v10 = vld [vmem:[%s10465_s0 + $0x16] sm:$0x1]  ;;  %v2920_v11 = vld [vmem:[%s10465_s0 + $0x1e] sm:$0x1]  ;;  %v2921_v12 = vld [vmem:[%s10465_s0 + $0x26] sm:$0x1] }
  0x1b   :  { %8391 = vmatpush3.msra.mxu0 %v9297_v23  ;;  %8392 = vmatprep.mubr.msk.f32.mxu0 %vm9208_vm2, %v9207_v0  ;;  %v1513_v5 = vsel %vm74_vm9, %v1512_v55, 0  ;;  %v1985_v14 = vrot.slane %v1966_v62, 3  ;;  %v1987_v16 = vrot.slane %v9469_v63, 2  ;;  %v1989_v17 = vrot.slane %v9475_v2, 1  ;;  %v2439_v18 = vld [vmem:[%s10465_s0 + $0x5] sm:$0x1] }
  0x1c   :  { %8400 = vmatprep.subr.mxu0 %v9207_v0  ;;  %8416 = vmatpush3.msra.mxu1 %v9268_v8  ;;  %v629_v1 = vand.u32 4294901760, %v628_v57  ;;  %v1105_v13 = vand.u32 4294901760, %v9461_v61  ;;  %v2917_v19 = vld [vmem:[%s10465_s0 + $0x6] sm:$0x1]  ;;  %v2455_v21 = vrot.slane %v2440_v4, 7  ;;  %v2933_v25 = vrot.slane %v2918_v9, 7 }
  0x1d   :  { %8417 = vmatprep.mubr.msk.f32.mxu1 %vm9208_vm2, %v9207_v0  ;;  %8425 = vmatprep.subr.mxu1 %v9207_v0  ;;  %v2922_v22 = vld [vmem:[%s10465_s0 + $0x2e] sm:$0x1]  ;;  %v2923_v24 = vld [vmem:[%s10465_s0 + $0x36] sm:$0x1]  ;;  %v9532_v26 = vand.u32 4294901760, %v1513_v5  ;;  %v2935_v29 = vrot.slane %v2919_v10, 6 }
  0x1e   :  { %8393 = vmatmul.mubr.f32.vlgmr.msra.gmra.mxu0 %v9332_v46  ;;  %8418 = vmatmul.mubr.f32.vlgmr.msra.gmra.mxu1 %v627_v48  ;;  %v1982_v46 = vsel %vm60_vm4, %v1981_v59, %v1980_v60  ;;  %v2924_v27 = vld [vmem:[%s10465_s0 + $0x3e] sm:$0x1]  ;;  %v2937_v30 = vrot.slane %v2920_v11, 5  ;;  %v2939_v31 = vrot.slane %v2921_v12, 4  ;;  %v2457_v32 = vrot.slane %v9488_v6, 6 }
  0x1f   :  { %8401 = vmatpush3.msra.mxu0 %v9268_v8  ;;  %8402 = vmatprep.mubr.msk.f32.mxu0 %vm9208_vm2, %v9207_v0  ;;  %v1984_v20 = vsel %vm63_vm5, %v1983_v3, %v1982_v46  ;;  %v2459_v33 = vrot.slane %v9493_v7, 5  ;;  %v2934_v34 = vsel %vm54_vm1, %v2933_v25, %v2917_v19  ;;  %v3396_v35 = vld [vmem:[%s10465_s0 + $0xf] sm:$0x1]  ;;  %v3397_v36 = vld [vmem:[%s10465_s0 + $0x17] sm:$0x1]  ;;  %v2941_v41 = vrot.slane %v2922_v22, 3 }
  0x20   :  { %8410 = vmatprep.subr.mxu0 %v9207_v0  ;;  %8426 = vmatpush3.msra.mxu1 %v9268_v8  ;;  %v1986_v37 = vsel %vm66_vm6, %v1985_v14, %v1984_v20  ;;  %v2936_v39 = vsel %vm57_vm3, %v2935_v29, %v2934_v34  ;;  %v2943_v42 = vrot.slane %v2923_v24, 2  ;;  %v3398_v43 = vld [vmem:[%s10465_s0 + $0x1f] sm:$0x1]  ;;  %v3399_v44 = vld [vmem:[%s10465_s0 + $0x27] sm:$0x1]  ;;  %v1106_v45 = vsub.f32 %v9461_v61, %v1105_v13 }
  0x21   :  { %8427 = vmatprep.mubr.msk.f32.mxu1 %vm9208_vm2, %v9207_v0  ;;  %8435 = vmatprep.subr.mxu1 %v9207_v0  ;;  %v2456_v47 = vsel %vm54_vm1, %v2455_v21, %v2439_v18  ;;  %v2938_v48 = vsel %vm60_vm4, %v2937_v30, %v2936_v39  ;;  %v2945_v49 = vrot.slane %v2924_v27, 1  ;;  %v3395_v50 = vld [vmem:[%s10465_s0 + $0x7] sm:$0x1]  ;;  %v3400_v51 = vld [vmem:[%s10465_s0 + $0x2f] sm:$0x1]  ;;  %v3411_v56 = vrot.slane %v3396_v35, 7 }
  0x22   :  { %8403 = vmatmul.mubr.f32.vlgmr.msra.gmra.mxu0 %v629_v1  ;;  %8428 = vmatmul.mubr.f32.vlgmr.msra.gmra.mxu1 %v9402_v28  ;;  %v2940_v52 = vsel %vm63_vm5, %v2939_v31, %v2938_v48  ;;  %v3401_v54 = vld [vmem:[%s10465_s0 + $0x37] sm:$0x1]  ;;  %v3413_v57 = vrot.slane %v3397_v36, 6  ;;  %v1988_v58 = vsel %vm69_vm7, %v1987_v16, %v1986_v37  ;;  %v2443_v59 = vld [vmem:[%s10465_s0 + $0x25] sm:$0x1]  ;;  %v3415_v62 = vrot.slane %v3398_v43, 5 }
  0x23   :  { %8411 = vmatpush3.msra.mxu0 %v9282_v15  ;;  %8412 = vmatprep.mubr.msk.f32.mxu0 %vm9208_vm2, %v9207_v0  ;;  %v2942_v55 = vsel %vm66_vm6, %v2941_v41, %v2940_v52  ;;  %v3402_v60 = vld [vmem:[%s10465_s0 + $0x3f] sm:$0x1]  ;;  %v3417_v63 = vrot.slane %v3399_v44, 4  ;;  %v2458_v1 = vsel %vm57_vm3, %v2457_v32, %v2456_v47  ;;  %v3412_v4 = vsel %vm54_vm1, %v3411_v56, %v3395_v50  ;;  %v2444_v10 = vld [vmem:[%s10465_s0 + $0x2d] sm:$0x1] }
  0x24   :  { %8420 = vmatprep.subr.mxu0 %v9207_v0  ;;  %8436 = vmatpush3.msra.mxu1 %v9323_v40  ;;  %v2944_v3 = vsel %vm69_vm7, %v2943_v42, %v2942_v55  ;;  %v1107_v46 = vand.u32 4294901760, %v1106_v45  ;;  %v3414_v7 = vsel %vm57_vm3, %v3413_v57, %v3412_v4  ;;  %v3421_v9 = vrot.slane %v3401_v54, 2  ;;  %v2445_v2 = vld [vmem:[%s10465_s0 + $0x35] sm:$0x1]  ;;  %v2446_v29 = vld [vmem:[%s10465_s0 + $0x3d] sm:$0x1] }
  0x25   :  { %8437 = vmatprep.mubr.msk.f32.mxu1 %vm9208_vm2, %v9207_v0  ;;  %8445 = vmatprep.subr.mxu1 %v9207_v0  ;;  %v2946_v6 = vsel %vm72_vm8, %v2945_v49, %v2944_v3  ;;  %v2461_v11 = vrot.slane %v2443_v59, 4  ;;  %v3416_v12 = vsel %vm60_vm4, %v3415_v62, %v3414_v7  ;;  %v1990_v14 = vsel %vm72_vm8, %v1989_v17, %v1988_v58  ;;  %v28_v54 = vld [vmem:[%s10466_s2 + $0x10] sm:$0xff]  ;;  %v27_v55 = vld [vmem:[%s10466_s2 + $0x8] sm:$0xff] }
  0x26   :  { %8413 = vmatmul.mubr.f32.vlgmr.msra.gmra.mxu0 %v9418_v38  ;;  %8438 = vmatmul.mubr.f32.vlgmr.msra.gmra.mxu1 %v9440_v53  ;;  %v9576_v38 = vsub.f32 %v1513_v5, %v9532_v26  ;;  %v3419_v5 = vrot.slane %v3400_v51, 3  ;;  %v2460_v16 = vsel %vm60_vm4, %v2459_v33, %v2458_v1  ;;  %v3418_v18 = vsel %vm63_vm5, %v3417_v63, %v3416_v12  ;;  %v29_v51 = vld [vmem:[%s10466_s2 + $0x18] sm:$0xff]  ;;  %v26_v63 = vld [vmem:[%s10466_s2] sm:$0xff] }
  0x27   :  { %8421 = vmatpush3.msra.mxu0 %v9297_v23  ;;  %8422 = vmatprep.mubr.msk.f32.mxu0 %vm9208_vm2, %v9207_v0  ;;  %v2463_v17 = vrot.slane %v2444_v10, 3  ;;  %v1991_v22 = vsel %vm74_vm9, %v1990_v14, 0  ;;  %v2462_v24 = vsel %vm63_vm5, %v2461_v11, %v2460_v16  ;;  %v2465_v30 = vrot.slane %v2445_v2, 2  ;;  %v9955_v2 = vld [vmem:[%s10467_s3] ss:$0 sm:$0xff]  ;;  %s9209_s3 = smov 64  }
  0x28   :  { %8430 = vmatprep.subr.mxu0 %v9207_v0  ;;  %8446 = vmatpush3.msra.mxu1 %v9268_v8  ;;  %v3420_v19 = vsel %vm66_vm6, %v3419_v5, %v3418_v18  ;;  %v1583_v20 = vand.u32 4294901760, %v9576_v38  ;;  %v9650_v32 = vand.u32 4294901760, %v1991_v22  ;;  %v2467_v34 = vrot.slane %v2446_v29, 1 }
  0x29   :  { %8447 = vmatprep.mubr.msk.f32.mxu1 %vm9208_vm2, %v9207_v0  ;;  %8455 = vmatprep.subr.mxu1 %v9207_v0  ;;  %v3422_v21 = vsel %vm69_vm7, %v3421_v9, %v3420_v19  ;;  %v2464_v33 = vsel %vm66_vm6, %v2463_v17, %v2462_v24  ;;  %v9761_v56 = vand.u32 4294901760, %v29_v51  ;;  %v9769_v59 = vand.u32 4294901760, %v28_v54 }
  0x2a   :  { %8423 = vmatmul.mubr.f32.vlgmr.msra.gmra.mxu0 %v9402_v28  ;;  %8448 = vmatmul.mubr.f32.vlgmr.msra.gmra.mxu1 %v1105_v13  ;;  %v9610_v28 = vsel %vm74_vm9, %v2946_v6, 0  ;;  %v3423_v13 = vrot.slane %v3402_v60, 1  ;;  %v1584_v31 = vsub.f32 %v9576_v38, %v1583_v20  ;;  %v2060_v36 = vsub.f32 %v1991_v22, %v9650_v32 }
  0x2b   :  { %8431 = vmatpush3.msra.mxu0 %v9268_v8  ;;  %8432 = vmatprep.mubr.msk.f32.mxu0 %vm9208_vm2, %v9207_v0  ;;  %v9716_v47 = vand.u32 4294901760, %v9610_v28  ;;  %v9780_v60 = vsub.f32 %v29_v51, %v9761_v56  ;;  %v9785_v62 = vand.u32 4294901760, %v27_v55  ;;  %v9792_v3 = vsub.f32 %v28_v54, %v9769_v59 }
  0x2c   :  { %8440 = vmatprep.subr.mxu0 %v9207_v0  ;;  %8456 = vmatpush3.msra.mxu1 %v9268_v8  ;;  %v3424_v25 = vsel %vm72_vm8, %v3423_v13, %v3422_v21  ;;  %v1585_v35 = vand.u32 4294901760, %v1584_v31  ;;  %v9802_v5 = vand.u32 4294901760, %v26_v63  ;;  %vm3873_vm10 = vcmask 261120  }
  0x2d   :  { %8457 = vmatprep.mubr.msk.f32.mxu1 %vm9208_vm2, %v9207_v0  ;;  %8465 = vmatprep.subr.mxu1 %v9207_v0  ;;  %v9639_v27 = vsel %vm74_vm9, %v3424_v25, 0  ;;  %v3016_v49 = vsub.f32 %v9610_v28, %v9716_v47  ;;  %v9800_v4 = vand.u32 4294901760, %v9780_v60  ;;  %v9812_v7 = vand.u32 4294901760, %v9792_v3 }
  0x2e   :  { %8433 = vmatmul.mubr.f32.vlgmr.msra.gmra.mxu0 %v1107_v46  ;;  %8458 = vmatmul.mubr.f32.vlgmr.msra.gmra.mxu1 %v9440_v53  ;;  %v9751_v52 = vand.u32 4294901760, %v9639_v27  ;;  %v9808_v46 = vsub.f32 %v27_v55, %v9785_v62  ;;  %v9822_v9 = vsub.f32 %v26_v63, %v9802_v5  ;;  %vm8017_vm11 = vcmask 7168  }
  0x2f   :  { %8441 = vmatpush3.msra.mxu0 %v9282_v15  ;;  %8442 = vmatprep.mubr.msk.f32.mxu0 %vm9208_vm2, %v9207_v0  ;;  %v3017_v50 = vand.u32 4294901760, %v3016_v49  ;;  %v3991_v28 = vsub.f32 %v9792_v3, %v9812_v7 }
  0x30   :  { %8450 = vmatprep.subr.mxu0 %v9207_v0  ;;  %8466 = vmatpush3.msra.mxu1 %v9323_v40  ;;  %v3494_v58 = vsub.f32 %v9639_v27, %v9751_v52  ;;  %v9828_v10 = vand.u32 4294901760, %v9808_v46  ;;  %v9841_v13 = vand.u32 4294901760, %v9822_v9 }
  0x31   :  { %8467 = vmatprep.mubr.msk.f32.mxu1 %vm9208_vm2, %v9207_v0  ;;  %8475 = vmatprep.subr.mxu1 %v9207_v0  ;;  %v9849_v16 = vand.u32 4294901760, %v3991_v28 }
  0x32   :  { %8443 = vmatmul.mubr.f32.vlgmr.msra.gmra.mxu0 %v9461_v61  ;;  %8468 = vmatmul.mubr.f32.vlgmr.msra.gmra.mxu1 %v9532_v26  ;;  %v2466_v61 = vsel %vm69_vm7, %v2465_v30, %v2464_v33  ;;  %v3495_v1 = vand.u32 4294901760, %v3494_v58  ;;  %v3998_v14 = vsub.f32 %v9808_v46, %v9828_v10 }
  0x33   :  { %8451 = vmatpush3.msra.mxu0 %v9297_v23  ;;  %8452 = vmatprep.mubr.msk.f32.mxu0 %vm9208_vm2, %v9207_v0  ;;  %v2468_v37 = vsel %vm72_vm8, %v2467_v34, %v2466_v61 }
  0x34   :  { %8460 = vmatprep.subr.mxu0 %v9207_v0  ;;  %8476 = vmatpush3.msra.mxu1 %v9268_v8  ;;  %v2469_v39 = vsel %vm74_vm9, %v2468_v37, 0  ;;  %v3496_v6 = vsub.f32 %v3494_v58, %v3495_v1  ;;  %v9859_v18 = vand.u32 4294901760, %v3998_v14 }
  0x35   :  { %8477 = vmatprep.mubr.msk.f32.mxu1 %vm9208_vm2, %v9207_v0  ;;  %8485 = vmatprep.subr.mxu1 %v9207_v0  ;;  %v9685_v42 = vand.u32 4294901760, %v2469_v39 }
  0x36   :  { %8453 = vmatmul.mubr.f32.vlgmr.msra.gmra.mxu0 %v9440_v53  ;;  %8478 = vmatmul.mubr.f32.vlgmr.msra.gmra.mxu1 %v1583_v20  ;;  %v2061_v53 = vand.u32 4294901760, %v2060_v36  ;;  %v3497_v11 = vand.u32 4294901760, %v3496_v6 }
  0x37   :  { %8461 = vmatpush3.msra.mxu0 %v9268_v8  ;;  %8462 = vmatprep.mubr.msk.f32.mxu0 %vm9208_vm2, %v9207_v0  ;;  %v2538_v44 = vsub.f32 %v2469_v39, %v9685_v42 }
  0x38   :  { %8470 = vmatprep.subr.mxu0 %v9207_v0  ;;  %8486 = vmatpush3.msra.mxu1 %v9268_v8  ;;  %v2062_v41 = vsub.f32 %v2060_v36, %v2061_v53 }
  0x39   :  { %8487 = vmatprep.mubr.msk.f32.mxu1 %vm9208_vm2, %v9207_v0  ;;  %8495 = vmatprep.subr.mxu1 %v9207_v0 }
  0x3a   :  { %8463 = vmatmul.mubr.f32.vlgmr.msra.gmra.mxu0 %v1585_v35  ;;  %8488 = vmatmul.mubr.f32.vlgmr.msra.gmra.mxu1 %v9532_v26  ;;  %v2063_v43 = vand.u32 4294901760, %v2062_v41 }
  0x3b   :  { %8471 = vmatpush3.msra.mxu0 %v9282_v15  ;;  %8472 = vmatprep.mubr.msk.f32.mxu0 %vm9208_vm2, %v9207_v0 }
  0x3c   :  { %8480 = vmatprep.subr.mxu0 %v9207_v0  ;;  %8496 = vmatpush3.msra.mxu1 %v9323_v40 }
  0x3d   :  { %8497 = vmatprep.mubr.msk.f32.mxu1 %vm9208_vm2, %v9207_v0  ;;  %8505 = vmatprep.subr.mxu1 %v9207_v0 }
  0x3e   :  { %8473 = vmatmul.mubr.f32.vlgmr.msra.gmra.mxu0 %v9576_v38  ;;  %8498 = vmatmul.mubr.f32.vlgmr.msra.gmra.mxu1 %v9650_v32  ;;  %v3018_v38 = vsub.f32 %v3016_v49, %v3017_v50 }
  0x3f   :  { %8481 = vmatpush3.msra.mxu0 %v9297_v23  ;;  %8482 = vmatprep.mubr.msk.f32.mxu0 %vm9208_vm2, %v9207_v0 }
  0x40   :  { %8490 = vmatprep.subr.mxu0 %v9207_v0  ;;  %8506 = vmatpush3.msra.mxu1 %v9268_v8  ;;  %v3019_v57 = vand.u32 4294901760, %v3018_v38 }
  0x41   :  { %8507 = vmatprep.mubr.msk.f32.mxu1 %vm9208_vm2, %v9207_v0  ;;  %8515 = vmatprep.subr.mxu1 %v9207_v0 }
  0x42   :  { %8483 = vmatmul.mubr.f32.vlgmr.msra.gmra.mxu0 %v9532_v26  ;;  %8508 = vmatmul.mubr.f32.vlgmr.msra.gmra.mxu1 %v2061_v53  ;;  %v2539_v26 = vand.u32 4294901760, %v2538_v44 }
  0x43   :  { %8491 = vmatpush3.msra.mxu0 %v9268_v8  ;;  %8492 = vmatprep.mubr.msk.f32.mxu0 %vm9208_vm2, %v9207_v0 }
  0x44   :  { %8500 = vmatprep.subr.mxu0 %v9207_v0  ;;  %8516 = vmatpush3.msra.mxu1 %v9268_v8  ;;  %v2540_v45 = vsub.f32 %v2538_v44, %v2539_v26 }
  0x45   :  { %8517 = vmatprep.mubr.msk.f32.mxu1 %vm9208_vm2, %v9207_v0  ;;  %8525 = vmatprep.subr.mxu1 %v9207_v0 }
  0x46   :  { %8493 = vmatmul.mubr.f32.vlgmr.msra.gmra.mxu0 %v2063_v43  ;;  %8518 = vmatmul.mubr.f32.vlgmr.msra.gmra.mxu1 %v9650_v32  ;;  %v2541_v48 = vand.u32 4294901760, %v2540_v45 }
  0x47   :  { %8501 = vmatpush3.msra.mxu0 %v9282_v15  ;;  %8502 = vmatprep.mubr.msk.f32.mxu0 %vm9208_vm2, %v9207_v0 }
  0x48   :  { %8510 = vmatprep.subr.mxu0 %v9207_v0  ;;  %8526 = vmatpush3.msra.mxu1 %v9323_v40 }
  0x49   :  { %8527 = vmatprep.mubr.msk.f32.mxu1 %vm9208_vm2, %v9207_v0  ;;  %8535 = vmatprep.subr.mxu1 %v9207_v0 }
  0x4a   :  { %8503 = vmatmul.mubr.f32.vlgmr.msra.gmra.mxu0 %v2060_v36  ;;  %8528 = vmatmul.mubr.f32.vlgmr.msra.gmra.mxu1 %v9685_v42 }
  0x4b   :  { %8511 = vmatpush3.msra.mxu0 %v9297_v23  ;;  %8512 = vmatprep.mubr.msk.f32.mxu0 %vm9208_vm2, %v9207_v0 }
  0x4c   :  { %8520 = vmatprep.subr.mxu0 %v9207_v0  ;;  %8536 = vmatpush3.msra.mxu1 %v9268_v8 }
  0x4d   :  { %8537 = vmatprep.mubr.msk.f32.mxu1 %vm9208_vm2, %v9207_v0  ;;  %8545 = vmatprep.subr.mxu1 %v9207_v0 }
  0x4e   :  { %8513 = vmatmul.mubr.f32.vlgmr.msra.gmra.mxu0 %v9650_v32  ;;  %8538 = vmatmul.mubr.f32.vlgmr.msra.gmra.mxu1 %v2539_v26 }
  0x4f   :  { %8521 = vmatpush3.msra.mxu0 %v9268_v8  ;;  %8522 = vmatprep.mubr.msk.f32.mxu0 %vm9208_vm2, %v9207_v0 }
  0x50   :  { %8530 = vmatprep.subr.mxu0 %v9207_v0  ;;  %8546 = vmatpush3.msra.mxu1 %v9268_v8 }
  0x51   :  { %8547 = vmatprep.mubr.msk.f32.mxu1 %vm9208_vm2, %v9207_v0  ;;  %8555 = vmatprep.subr.mxu1 %v9207_v0 }
  0x52   :  { %8523 = vmatmul.mubr.f32.vlgmr.msra.gmra.mxu0 %v2541_v48  ;;  %8548 = vmatmul.mubr.f32.vlgmr.msra.gmra.mxu1 %v9685_v42 }
  0x53   :  { %8531 = vmatpush3.msra.mxu0 %v9282_v15  ;;  %8532 = vmatprep.mubr.msk.f32.mxu0 %vm9208_vm2, %v9207_v0 }
  0x54   :  { %8540 = vmatprep.subr.mxu0 %v9207_v0  ;;  %8556 = vmatpush3.msra.mxu1 %v9323_v40 }
  0x55   :  { %8557 = vmatprep.mubr.msk.f32.mxu1 %vm9208_vm2, %v9207_v0  ;;  %8565 = vmatprep.subr.mxu1 %v9207_v0 }
  0x56   :  { %8533 = vmatmul.mubr.f32.vlgmr.msra.gmra.mxu0 %v2538_v44  ;;  %8558 = vmatmul.mubr.f32.vlgmr.msra.gmra.mxu1 %v9716_v47 }
  0x57   :  { %8541 = vmatpush3.msra.mxu0 %v9297_v23  ;;  %8542 = vmatprep.mubr.msk.f32.mxu0 %vm9208_vm2, %v9207_v0 }
  0x58   :  { %8550 = vmatprep.subr.mxu0 %v9207_v0  ;;  %8566 = vmatpush3.msra.mxu1 %v9268_v8 }
  0x59   :  { %8567 = vmatprep.mubr.msk.f32.mxu1 %vm9208_vm2, %v9207_v0  ;;  %8575 = vmatprep.subr.mxu1 %v9207_v0 }
  0x5a   :  { %8543 = vmatmul.mubr.f32.vlgmr.msra.gmra.mxu0 %v9685_v42  ;;  %8568 = vmatmul.mubr.f32.vlgmr.msra.gmra.mxu1 %v3017_v50 }
  0x5b   :  { %8551 = vmatpush3.msra.mxu0 %v9268_v8  ;;  %8552 = vmatprep.mubr.msk.f32.mxu0 %vm9208_vm2, %v9207_v0 }
  0x5c   :  { %8560 = vmatprep.subr.mxu0 %v9207_v0  ;;  %8576 = vmatpush3.msra.mxu1 %v9268_v8 }
  0x5d   :  { %8577 = vmatprep.mubr.msk.f32.mxu1 %vm9208_vm2, %v9207_v0  ;;  %8585 = vmatprep.subr.mxu1 %v9207_v0 }
  0x5e   :  { %8553 = vmatmul.mubr.f32.vlgmr.msra.gmra.mxu0 %v3019_v57  ;;  %8578 = vmatmul.mubr.f32.vlgmr.msra.gmra.mxu1 %v9716_v47 }
  0x5f   :  { %8561 = vmatpush3.msra.mxu0 %v9282_v15  ;;  %8562 = vmatprep.mubr.msk.f32.mxu0 %vm9208_vm2, %v9207_v0 }
  0x60   :  { %8570 = vmatprep.subr.mxu0 %v9207_v0  ;;  %8586 = vmatpush3.msra.mxu1 %v9323_v40  ;;  %v3984_v40 = vsub.f32 %v9780_v60, %v9800_v4 }
  0x61   :  { %8587 = vmatprep.mubr.msk.f32.mxu1 %vm9208_vm2, %v9207_v0  ;;  %8595 = vmatprep.subr.mxu1 %v9207_v0 }
  0x62   :  { %8563 = vmatmul.mubr.f32.vlgmr.msra.gmra.mxu0 %v3016_v49  ;;  %8588 = vmatmul.mubr.f32.vlgmr.msra.gmra.mxu1 %v9751_v52  ;;  %v9838_v12 = vand.u32 4294901760, %v3984_v40 }
  0x63   :  { %8571 = vmatpush3.msra.mxu0 %v9297_v23  ;;  %8572 = vmatprep.mubr.msk.f32.mxu0 %vm9208_vm2, %v9207_v0 }
  0x64   :  { %8580 = vmatprep.subr.mxu0 %v9207_v0  ;;  %8596 = vmatpush3.msra.mxu1 %v9268_v8 }
  0x65   :  { %8597 = vmatprep.mubr.msk.f32.mxu1 %vm9208_vm2, %v9207_v0  ;;  %8605 = vmatprep.subr.mxu1 %v9207_v0 }
  0x66   :  { %8573 = vmatmul.mubr.f32.vlgmr.msra.gmra.mxu0 %v9716_v47  ;;  %8598 = vmatmul.mubr.f32.vlgmr.msra.gmra.mxu1 %v3495_v1 }
  0x67   :  { %8581 = vmatpush3.msra.mxu0 %v9268_v8  ;;  %8582 = vmatprep.mubr.msk.f32.mxu0 %vm9208_vm2, %v9207_v0 }
  0x68   :  { %8590 = vmatprep.subr.mxu0 %v9207_v0  ;;  %8606 = vmatpush3.msra.mxu1 %v9268_v8  ;;  %v4005_v8 = vsub.f32 %v9822_v9, %v9841_v13 }
  0x69   :  { %8607 = vmatprep.mubr.msk.f32.mxu1 %vm9208_vm2, %v9207_v0  ;;  %8621 = vmatprep.subr.mxu1 %v9207_v0 }
  0x6a   :  { %8583 = vmatmul.mubr.f32.vlgmr.msra.gmra.mxu0 %v3497_v11  ;;  %8608 = vmatmul.mubr.f32.vlgmr.msra.gmra.mxu1 %v9751_v52 }
  0x6b   :  { %8591 = vmatpush3.msra.mxu0 %v9282_v15  ;;  %8592 = vmatprep.mubr.msk.f32.mxu0 %vm9208_vm2, %v9207_v0  ;;  %v9869_v15 = vand.u32 4294901760, %v4005_v8 }
  0x6c   :  { %8600 = vmatprep.subr.mxu0 %v9207_v0  ;;  %8622 = vmatpush3.msra.mxu1 %v9838_v12 }
  0x6d   :  { %8623 = vmatprep.subr.mxu1 %v9207_v0  ;;  %8629 = vmatprep.mubr.msk.f32.mxu1 %vm9208_vm2, %v9207_v0 }
  0x6e   :  { %8593 = vmatmul.mubr.f32.vlgmr.msra.gmra.mxu0 %v3494_v58  ;;  %8624 = vmatpush3.msra.mxu1 %v9849_v16 }
  0x6f   :  { %8601 = vmatpush3.msra.mxu0 %v9297_v23  ;;  %8602 = vmatprep.mubr.msk.f32.mxu0 %vm9208_vm2, %v9207_v0 }
  0x70   :  { %8610 = vmatprep.subr.mxu0 %v9207_v0  ;;  %8625 = vmatprep.subr.mxu1 %v9207_v0 }
  0x71   :  { %8626 = vmatpush3.msra.mxu1 %v9859_v18 }
  0x72   :  { %8603 = vmatmul.mubr.f32.vlgmr.msra.gmra.mxu0 %v9751_v52  ;;  %8627 = vmatprep.subr.mxu1 %v9207_v0 }
  0x73   :  { %8611 = vmatpush3.msra.mxu0 %v9761_v56  ;;  %8618 = vmatprep.mubr.msk.f32.mxu0 %vm9208_vm2, %v9207_v0 }
  0x74   :  { %8612 = vmatprep.subr.mxu0 %v9207_v0  ;;  %8628 = vmatpush3.msra.mxu1 %v9869_v15 }
  0x75   :  { %8613 = vmatpush3.msra.mxu0 %v9769_v59  ;;  %8643 = vmatprep.subr.mxu1 %v9207_v0 }
  0x76   :  { %8614 = vmatprep.subr.mxu0 %v9207_v0  ;;  %8630 = vmatmul.mubr.f32.vlgmr.msra.gmra.mxu1 %v9207_v0 }
  0x77   :  { %8615 = vmatpush3.msra.mxu0 %v9785_v62  ;;  %8644 = vmatpush3.msra.mxu1 %v9761_v56 }
  0x78   :  { %8616 = vmatprep.subr.mxu0 %v9207_v0  ;;  %8645 = vmatprep.subr.mxu1 %v9207_v0 }
  0x79   :  { %8617 = vmatpush3.msra.mxu0 %v9802_v5  ;;  %8646 = vmatpush3.msra.mxu1 %v9769_v59 }
  0x7a   :  { %8619 = vmatmul.mubr.f32.vlgmr.msra.gmra.mxu0 %v9207_v0  ;;  %8632 = vmatprep.subr.mxu0 %v9207_v0 }
  0x7b   :  { %8633 = vmatpush3.msra.mxu0 %v9780_v60  ;;  %8647 = vmatprep.subr.mxu1 %v9207_v0 }
  0x7c   :  { %8634 = vmatprep.subr.mxu0 %v9207_v0  ;;  %8648 = vmatpush3.msra.mxu1 %v9785_v62 }
  0x7d   :  { %8635 = vmatpush3.msra.mxu0 %v9792_v3  ;;  %8649 = vmatprep.subr.mxu1 %v9207_v0 }
  0x7e   :  { %8636 = vmatprep.subr.mxu0 %v9207_v0  ;;  %8640 = vmatprep.mubr.msk.f32.mxu0 %vm9208_vm2, %v9207_v0 }
  0x7f   :  { %8637 = vmatpush3.msra.mxu0 %v9808_v46  ;;  %8650 = vmatpush3.msra.mxu1 %v9802_v5 }
  0x80   :  { %8638 = vmatprep.subr.mxu0 %v9207_v0  ;;  %8651 = vmatprep.mubr.msk.f32.mxu1 %vm9208_vm2, %v9207_v0 }
  0x81   :  { %8639 = vmatpush3.msra.mxu0 %v9822_v9  ;;  %8665 = vmatprep.subr.mxu1 %v9207_v0 }
  0x82   :  { %8641 = vmatmul.mubr.f32.vlgmr.msra.gmra.mxu0 %v9207_v0  ;;  %8654 = vmatprep.subr.mxu0 %v9207_v0 }
  0x83   :  { %8652 = vmatmul.mubr.f32.vlgmr.msra.gmra.mxu1 %v9207_v0  ;;  %8655 = vmatpush3.msra.mxu0 %v9800_v4 }
  0x84   :  { %8666 = vmatpush3.msra.mxu1 %v9761_v56  ;;  %8656 = vmatprep.subr.mxu0 %v9207_v0 }
  0x85   :  { %8667 = vmatprep.subr.mxu1 %v9207_v0  ;;  %8657 = vmatpush3.msra.mxu0 %v9812_v7 }
  0x86   :  { %8668 = vmatpush3.msra.mxu1 %v9769_v59  ;;  %8658 = vmatprep.subr.mxu0 %v9207_v0 }
  0x87   :  { %8669 = vmatprep.subr.mxu1 %v9207_v0  ;;  %8659 = vmatpush3.msra.mxu0 %v9828_v10 }
  0x88   :  { %8670 = vmatpush3.msra.mxu1 %v9785_v62  ;;  %8660 = vmatprep.subr.mxu0 %v9207_v0 }
  0x89   :  { %8671 = vmatprep.subr.mxu1 %v9207_v0  ;;  %8661 = vmatpush3.msra.mxu0 %v9841_v13 }
  0x8a   :  { %8662 = vmatprep.mubr.msk.f32.mxu0 %vm9208_vm2, %v9207_v0  ;;  %8672 = vmatpush3.msra.mxu1 %v9802_v5 }
  0x8b   :  { %8673 = vmatprep.mubr.msk.f32.mxu1 %vm9208_vm2, %v9207_v0  ;;  %8663 = vmatmul.mubr.f32.vlgmr.msra.gmra.mxu0 %v9207_v0 }
  0x8c   :  { %8674 = vmatmul.mubr.f32.vlgmr.msra.gmra.mxu1 %v9207_v0  ;;  %8687 = vmatprep.subr.mxu1 %v9207_v0 }
  0x8d   :  { %8688 = vmatpush3.msra.mxu1 %v9838_v12  ;;  %8676 = vmatprep.subr.mxu0 %v9207_v0 }
  0x8e   :  { %8689 = vmatprep.subr.mxu1 %v9207_v0  ;;  %8695 = vmatprep.mubr.msk.f32.mxu1 %vm9208_vm2, %v9207_v0 }
  0x8f   :  { %8690 = vmatpush3.msra.mxu1 %v9849_v16  ;;  %8677 = vmatpush3.msra.mxu0 %v9761_v56 }
  0x90   :  { %8691 = vmatprep.subr.mxu1 %v9207_v0  ;;  %8678 = vmatprep.subr.mxu0 %v9207_v0 }
  0x91   :  { %8692 = vmatpush3.msra.mxu1 %v9859_v18  ;;  %8679 = vmatpush3.msra.mxu0 %v9769_v59 }
  0x92   :  { %8693 = vmatprep.subr.mxu1 %v9207_v0  ;;  %8680 = vmatprep.subr.mxu0 %v9207_v0 }
  0x93   :  { %8694 = vmatpush3.msra.mxu1 %v9869_v15  ;;  %8681 = vmatpush3.msra.mxu0 %v9785_v62 }
  0x94   :  { %8709 = vmatprep.subr.mxu1 %v9207_v0  ;;  %8682 = vmatprep.subr.mxu0 %v9207_v0 }
  0x95   :  { %8683 = vmatpush3.msra.mxu0 %v9802_v5  ;;  %8684 = vmatprep.mubr.msk.f32.mxu0 %vm9208_vm2, %v9207_v0 }
  0x96   :  { %8698 = vmatprep.subr.mxu0 %v9207_v0 }
  0xce   :  { %v229_v23 = vpop.f32.mrf.mxu1 }
  0xd0   :  { %v8379_v19 = vpop.f32.mrf.mxu1 }
  0xd2   :  { %v377_v20 = vpop.f32.mrf.mxu1 }
  0xd4   :  { %v8389_v17 = vpop.f32.mrf.mxu1 }
  0xd6   :  { %v153_v21 = vpop.f32.mrf.mxu0  ;;  %v523_v22 = vpop.f32.mrf.mxu1 }
  0xd7   :  { %v154_v24 = vadd.f32 %v9955_v2, %v153_v21 }
  0xd8   :  { %v8374_v25 = vpop.f32.mrf.mxu0  ;;  %v8399_v27 = vpop.f32.mrf.mxu1 }
  0xd9   :  { %v230_v29 = vadd.f32 %v229_v23, %v154_v24 }
  0xda   :  { %v303_v30 = vpop.f32.mrf.mxu0  ;;  %v707_v31 = vpop.f32.mrf.mxu1 }
  0xdb   :  { %v304_v32 = vadd.f32 %v303_v30, %v230_v29 }
  0xdc   :  { %v8384_v33 = vpop.f32.mrf.mxu0  ;;  %v8409_v34 = vpop.f32.mrf.mxu1 }
  0xdd   :  { %v378_v61 = vadd.f32 %v377_v20, %v304_v32 }
  0xde   :  { %v451_v35 = vpop.f32.mrf.mxu0  ;;  %v855_v36 = vpop.f32.mrf.mxu1 }
  0xdf   :  { %v452_v37 = vadd.f32 %v451_v35, %v378_v61 }
  0xe0   :  { %v8394_v53 = vpop.f32.mrf.mxu0  ;;  %v8419_v39 = vpop.f32.mrf.mxu1 }
  0xe1   :  { %v9958_v41 = vadd.f32 %v523_v22, %v452_v37 }
  0xe2   :  { %v631_v42 = vpop.f32.mrf.mxu0  ;;  %v1001_v43 = vpop.f32.mrf.mxu1 }
  0xe3   :  { %v632_v44 = vadd.f32 %v9955_v2, %v631_v42 }
  0xe4   :  { %v8404_v26 = vpop.f32.mrf.mxu0  ;;  %v8429_v45 = vpop.f32.mrf.mxu1 }
  0xe5   :  { %v708_v47 = vadd.f32 %v707_v31, %v632_v44 }
  0xe6   :  { %v781_v48 = vpop.f32.mrf.mxu0  ;;  %v1185_v49 = vpop.f32.mrf.mxu1 }
  0xe7   :  { %v782_v50 = vadd.f32 %v781_v48, %v708_v47 }
  0xe8   :  { %v8414_v51 = vpop.f32.mrf.mxu0  ;;  %v8439_v38 = vpop.f32.mrf.mxu1 }
  0xe9   :  { %v856_v52 = vadd.f32 %v855_v36, %v782_v50 }
  0xea   :  { %v929_v54 = vpop.f32.mrf.mxu0  ;;  %v1333_v57 = vpop.f32.mrf.mxu1 }
  0xeb   :  { %v930_v58 = vadd.f32 %v929_v54, %v856_v52 }
  0xec   :  { %v8424_v55 = vpop.f32.mrf.mxu0  ;;  %v8449_v63 = vpop.f32.mrf.mxu1 }
  0xed   :  { %v9961_v1 = vadd.f32 %v1001_v43, %v930_v58 }
  0xee   :  { %v1109_v6 = vpop.f32.mrf.mxu0  ;;  %v1479_v40 = vpop.f32.mrf.mxu1 }
  0xef   :  { %v1110_v11 = vadd.f32 %v9955_v2, %v1109_v6 }
  0xf0   :  { %v8434_v28 = vpop.f32.mrf.mxu0  ;;  %v8459_v14 = vpop.f32.mrf.mxu1 }
  0xf1   :  { %v1186_v8 = vadd.f32 %v1185_v49, %v1110_v11 }
  0xf2   :  { %v1259_v23 = vpop.f32.mrf.mxu0  ;;  %v1663_v19 = vpop.f32.mrf.mxu1 }
  0xf3   :  { %v1260_v20 = vadd.f32 %v1259_v23, %v1186_v8 }
  0xf4   :  { %v8444_v17 = vpop.f32.mrf.mxu0  ;;  %v8469_v21 = vpop.f32.mrf.mxu1 }
  0xf5   :  { %v1334_v22 = vadd.f32 %v1333_v57, %v1260_v20 }
  0xf6   :  { %v1407_v24 = vpop.f32.mrf.mxu0  ;;  %v1811_v25 = vpop.f32.mrf.mxu1 }
  0xf7   :  { %v1408_v27 = vadd.f32 %v1407_v24, %v1334_v22 }
  0xf8   :  { %v8454_v29 = vpop.f32.mrf.mxu0  ;;  %v8479_v30 = vpop.f32.mrf.mxu1 }
  0xf9   :  { %v9964_v31 = vadd.f32 %v1479_v40, %v1408_v27 }
  0xfa   :  { %v1587_v32 = vpop.f32.mrf.mxu0  ;;  %v1957_v33 = vpop.f32.mrf.mxu1 }
  0xfb   :  { %v1588_v34 = vadd.f32 %v9955_v2, %v1587_v32 }
  0xfc   :  { %v8464_v61 = vpop.f32.mrf.mxu0  ;;  %v8489_v35 = vpop.f32.mrf.mxu1 }
  0xfd   :  { %v1664_v36 = vadd.f32 %v1663_v19, %v1588_v34 }
  0xfe   :  { %v1737_v37 = vpop.f32.mrf.mxu0  ;;  %v2141_v53 = vpop.f32.mrf.mxu1 }
  0xff   :  { %v1738_v39 = vadd.f32 %v1737_v37, %v1664_v36 }
 0x100   :  { %v8474_v42 = vpop.f32.mrf.mxu0  ;;  %v8499_v43 = vpop.f32.mrf.mxu1 }
 0x101   :  { %v1812_v44 = vadd.f32 %v1811_v25, %v1738_v39 }
 0x102   :  { %v1885_v26 = vpop.f32.mrf.mxu0  ;;  %v2289_v45 = vpop.f32.mrf.mxu1 }
 0x103   :  { %v1886_v47 = vadd.f32 %v1885_v26, %v1812_v44 }
 0x104   :  { %v8484_v48 = vpop.f32.mrf.mxu0  ;;  %v8509_v49 = vpop.f32.mrf.mxu1 }
 0x105   :  { %v9967_v50 = vadd.f32 %v1957_v33, %v1886_v47 }
 0x106   :  { %v2065_v51 = vpop.f32.mrf.mxu0  ;;  %v2435_v38 = vpop.f32.mrf.mxu1 }
 0x107   :  { %v2066_v52 = vadd.f32 %v9955_v2, %v2065_v51 }
 0x108   :  { %v8494_v54 = vpop.f32.mrf.mxu0  ;;  %v8519_v57 = vpop.f32.mrf.mxu1 }
 0x109   :  { %v2142_v58 = vadd.f32 %v2141_v53, %v2066_v52 }
 0x10a   :  { %v2215_v55 = vpop.f32.mrf.mxu0  ;;  %v2619_v63 = vpop.f32.mrf.mxu1 }
 0x10b   :  { %v2216_v6 = vadd.f32 %v2215_v55, %v2142_v58 }
 0x10c   :  { %v8504_v40 = vpop.f32.mrf.mxu0  ;;  %v8529_v11 = vpop.f32.mrf.mxu1 }
 0x10d   :  { %v2290_v28 = vadd.f32 %v2289_v45, %v2216_v6 }
 0x10e   :  { %v2363_v14 = vpop.f32.mrf.mxu0  ;;  %v2767_v8 = vpop.f32.mrf.mxu1 }
 0x10f   :  { %v2364_v23 = vadd.f32 %v2363_v14, %v2290_v28 }
 0x110   :  { %v8514_v19 = vpop.f32.mrf.mxu0  ;;  %v8539_v20 = vpop.f32.mrf.mxu1 }
 0x111   :  { %v9970_v17 = vadd.f32 %v2435_v38, %v2364_v23 }
 0x112   :  { %v2543_v21 = vpop.f32.mrf.mxu0  ;;  %v2913_v22 = vpop.f32.mrf.mxu1 }
 0x113   :  { %v2544_v24 = vadd.f32 %v9955_v2, %v2543_v21 }
 0x114   :  { %v8524_v25 = vpop.f32.mrf.mxu0  ;;  %v8549_v27 = vpop.f32.mrf.mxu1 }
 0x115   :  { %v2620_v29 = vadd.f32 %v2619_v63, %v2544_v24 }
 0x116   :  { %v2693_v30 = vpop.f32.mrf.mxu0  ;;  %v3097_v32 = vpop.f32.mrf.mxu1 }
 0x117   :  { %v2694_v33 = vadd.f32 %v2693_v30, %v2620_v29 }
 0x118   :  { %v8534_v34 = vpop.f32.mrf.mxu0  ;;  %v8559_v61 = vpop.f32.mrf.mxu1 }
 0x119   :  { %v2768_v35 = vadd.f32 %v2767_v8, %v2694_v33 }
 0x11a   :  { %v2841_v36 = vpop.f32.mrf.mxu0  ;;  %v3245_v37 = vpop.f32.mrf.mxu1 }
 0x11b   :  { %v2842_v53 = vadd.f32 %v2841_v36, %v2768_v35 }
 0x11c   :  { %v8544_v39 = vpop.f32.mrf.mxu0  ;;  %v8569_v42 = vpop.f32.mrf.mxu1 }
 0x11d   :  { %v9973_v43 = vadd.f32 %v2913_v22, %v2842_v53 }
 0x11e   :  { %v3021_v44 = vpop.f32.mrf.mxu0  ;;  %v3391_v26 = vpop.f32.mrf.mxu1 }
 0x11f   :  { %v3022_v45 = vadd.f32 %v9955_v2, %v3021_v44 }
 0x120   :  { %v8554_v47 = vpop.f32.mrf.mxu0  ;;  %v8579_v48 = vpop.f32.mrf.mxu1 }
 0x121   :  { %v3098_v49 = vadd.f32 %v3097_v32, %v3022_v45 }
 0x122   :  { %v3171_v51 = vpop.f32.mrf.mxu0  ;;  %v3575_v38 = vpop.f32.mrf.mxu1 }
 0x123   :  { %v3172_v52 = vadd.f32 %v3171_v51, %v3098_v49 }
 0x124   :  { %v8564_v54 = vpop.f32.mrf.mxu0  ;;  %v8589_v57 = vpop.f32.mrf.mxu1 }
 0x125   :  { %v3246_v58 = vadd.f32 %v3245_v37, %v3172_v52 }
 0x126   :  { %v3319_v55 = vpop.f32.mrf.mxu0  ;;  %v3723_v63 = vpop.f32.mrf.mxu1 }
 0x127   :  { %v3320_v6 = vadd.f32 %v3319_v55, %v3246_v58 }
 0x128   :  { %v8574_v40 = vpop.f32.mrf.mxu0  ;;  %v8599_v11 = vpop.f32.mrf.mxu1 }
 0x129   :  { %v9976_v28 = vadd.f32 %v3391_v26, %v3320_v6 }
 0x12a   :  { %v3499_v14 = vpop.f32.mrf.mxu0  ;;  %v3869_v8 = vpop.f32.mrf.mxu1 }
 0x12b   :  { %v3500_v23 = vadd.f32 %v9955_v2, %v3499_v14 }
 0x12c   :  { %v8584_v19 = vpop.f32.mrf.mxu0  ;;  %v8609_v20 = vpop.f32.mrf.mxu1 }
 0x12d   :  { %v3576_v21 = vadd.f32 %v3575_v38, %v3500_v23 }
 0x12e   :  { %v3649_v22 = vpop.f32.mrf.mxu0 }
 0x12f   :  { %v3650_v24 = vadd.f32 %v3649_v22, %v3576_v21 }
 0x130   :  { %v8594_v25 = vpop.f32.mrf.mxu0 }
 0x131   :  { %v3724_v27 = vadd.f32 %v3723_v63, %v3650_v24 }
 0x132   :  { %v3797_v29 = vpop.f32.mrf.mxu0 }
 0x133   :  { %v3798_v30 = vadd.f32 %v3797_v29, %v3724_v27 }
 0x134   :  { %v8604_v32 = vpop.f32.mrf.mxu0 }
 0x135   :  { %v9979_v33 = vadd.f32 %v3869_v8, %v3798_v30 }
 0x136   :  { %v4043_v34 = vpop.f32.mrf.mxu1 }
 0x138   :  { %v8631_v61 = vpop.f32.mrf.mxu1 }
 0x13a   :  { %v3952_v35 = vpop.f32.mrf.mxu0 }
 0x13b   :  { %v4044_v39 = vadd.f32 %v4043_v34, %v3952_v35 }
 0x13c   :  { %v8620_v36 = vpop.f32.mrf.mxu0 }
 0x142   :  { %v4123_v37 = vpop.f32.mrf.mxu0 }
 0x143   :  { %v4200_v53 = vpop.f32.mrf.mxu1  ;;  %v4124_v44 = vadd.f32 %v4123_v37, %v4044_v39 }
 0x144   :  { %v8642_v2 = vpop.f32.mrf.mxu0 }
 0x145   :  { %v8653_v42 = vpop.f32.mrf.mxu1  ;;  %v4201_v26 = vadd.f32 %v4200_v53, %v4124_v44 }
 0x14b   :  { %v4283_v45 = vpop.f32.mrf.mxu0 }
 0x14c   :  { %v4284_v47 = vadd.f32 %v4283_v45, %v4201_v26  ;;  %v4358_v48 = vpop.f32.mrf.mxu1 }
 0x14d   :  { %v8664_v49 = vpop.f32.mrf.mxu0 }
 0x14e   :  { %v4359_v51 = vadd.f32 %v4358_v48, %v4284_v47  ;;  %v8675_v38 = vpop.f32.mrf.mxu1 }
 0x150   :  { %v4362_v52 = vadd.f32 %v4359_v51, %v9958_v41 }
 0x152   :  { %9143 = vtanh.f32 %v4362_v52  ;;  %v8024_v57 = vmul.f32 -1.442695, %v4362_v52 }
 0x154   :  { %9145 = vpow2.f32 %v8024_v57 }
 0x15f   :  { %v9144_v54 = vpop.eup %9143 }
 0x160   :  { %4372 = vrot.lane.b32.xlu0 %v9144_v54, %s9209_s3 }
 0x161   :  { %v9146_v58 = vpop.eup %9145 }
 0x162   :  { %v4366_v55 = vadd.f32 1.0, %v9146_v58 }
 0x164   :  { %9147 = vrcp.f32 %v4366_v55 }
 0x171   :  { %v9148_v63 = vpop.eup %9147 }
 0x172   :  { %v4370_v11 = vmul.f32 0.0, %v9148_v63 }
 0x1d2   :  { %v4373_v6 = vpop.permute.xlu0 %4372 }
 0x1d3   :  { %v4375_v40 = vmul.f32 %v9148_v63, %v4373_v6 }
 0x1d5   :  { %4377 = vrot.lane.b32.xlu0 %v4375_v40, %s9210_s9 }
 0x247   :  { %v4378_v14 = vpop.permute.xlu0 %4377 }
 0x248   :  { %v9984_v8 = vadd.f32 %v4378_v14, %v4370_v11 }
 0x24a   :  { %9149 = vtanh.f32 %v9984_v8 }
 0x257   :  { %v9150_v41 = vpop.eup %9149 }
 0x258   :  { %4383 = vrot.lane.b32.xlu1 %v9150_v41, %s9209_s3 }
 0x2ca   :  { %v4384_v23 = vpop.permute.xlu1 %4383 }
 0x2cb   :  { %v4386_v19 = vmul.f32 %v9148_v63, %v4384_v23 }
 0x2cd   :  { %4388 = vrot.lane.b32.xlu1 %v4386_v19, %s9210_s9 }
 0x33f   :  { %v4389_v20 = vpop.permute.xlu1 %4388 }
 0x340   :  { %v4390_v21 = vsel %vm3873_vm10, %v4389_v20, 0 }
 0x341   :  { %v4461_v22 = vand.u32 4294901760, %v4390_v21 }
 0x343   :  { %v4462_v24 = vsub.f32 %v4390_v21, %v4461_v22  ;;  %8696 = vmatmul.mubr.f32.vlgmr.msra.gmra.mxu1 %v4461_v22 }
 0x344   :  { %8710 = vmatpush3.msra.mxu1 %v9761_v56  ;;  %8717 = vmatprep.mubr.msk.f32.mxu1 %vm9208_vm2, %v9207_v0 }
 0x345   :  { %v4463_v25 = vand.u32 4294901760, %v4462_v24  ;;  %8711 = vmatprep.subr.mxu1 %v9207_v0 }
 0x346   :  { %8712 = vmatpush3.msra.mxu1 %v9769_v59 }
 0x347   :  { %v4464_v27 = vsub.f32 %v4462_v24, %v4463_v25  ;;  %8713 = vmatprep.subr.mxu1 %v9207_v0 }
 0x348   :  { %8714 = vmatpush3.msra.mxu1 %v9785_v62 }
 0x349   :  { %v4465_v29 = vand.u32 4294901760, %v4464_v27  ;;  %8715 = vmatprep.subr.mxu1 %v9207_v0 }
 0x34a   :  { %8716 = vmatpush3.msra.mxu1 %v9802_v5 }
 0x34b   :  { %8718 = vmatmul.mubr.f32.vlgmr.msra.gmra.mxu1 %v4463_v25  ;;  %8731 = vmatprep.subr.mxu1 %v9207_v0 }
 0x34c   :  { %8685 = vmatmul.mubr.f32.vlgmr.msra.gmra.mxu0 %v4465_v29  ;;  %8732 = vmatpush3.msra.mxu1 %v9761_v56 }
 0x34d   :  { %8699 = vmatpush3.msra.mxu0 %v9780_v60  ;;  %8733 = vmatprep.subr.mxu1 %v9207_v0 }
 0x34e   :  { %8700 = vmatprep.subr.mxu0 %v9207_v0  ;;  %8734 = vmatpush3.msra.mxu1 %v9769_v59 }
 0x34f   :  { %8701 = vmatpush3.msra.mxu0 %v9792_v3  ;;  %8735 = vmatprep.subr.mxu1 %v9207_v0 }
 0x350   :  { %8702 = vmatprep.subr.mxu0 %v9207_v0  ;;  %8736 = vmatpush3.msra.mxu1 %v9785_v62 }
 0x351   :  { %8703 = vmatpush3.msra.mxu0 %v9808_v46  ;;  %8737 = vmatprep.subr.mxu1 %v9207_v0 }
 0x352   :  { %8704 = vmatprep.subr.mxu0 %v9207_v0  ;;  %8706 = vmatprep.mubr.msk.f32.mxu0 %vm9208_vm2, %v9207_v0 }
 0x353   :  { %8705 = vmatpush3.msra.mxu0 %v9822_v9  ;;  %8738 = vmatpush3.msra.mxu1 %v9802_v5 }
 0x354   :  { %8739 = vmatprep.mubr.msk.f32.mxu1 %vm9208_vm2, %v9207_v0  ;;  %8707 = vmatmul.mubr.f32.vlgmr.msra.gmra.mxu0 %v4462_v24 }
 0x355   :  { %8720 = vmatprep.subr.mxu0 %v9207_v0  ;;  %8740 = vmatmul.mubr.f32.vlgmr.msra.gmra.mxu1 %v4461_v22 }
 0x356   :  { %8721 = vmatpush3.msra.mxu0 %v9800_v4  ;;  %8728 = vmatprep.mubr.msk.f32.mxu0 %vm9208_vm2, %v9207_v0 }
 0x357   :  { %8722 = vmatprep.subr.mxu0 %v9207_v0  ;;  %8753 = vmatprep.subr.mxu1 %v9207_v0 }
 0x358   :  { %8723 = vmatpush3.msra.mxu0 %v9812_v7  ;;  %8754 = vmatpush3.msra.mxu1 %v9838_v12 }
 0x359   :  { %8724 = vmatprep.subr.mxu0 %v9207_v0  ;;  %8755 = vmatprep.subr.mxu1 %v9207_v0 }
 0x35a   :  { %8725 = vmatpush3.msra.mxu0 %v9828_v10  ;;  %8756 = vmatpush3.msra.mxu1 %v9849_v16 }
 0x35b   :  { %8726 = vmatprep.subr.mxu0 %v9207_v0  ;;  %8757 = vmatprep.subr.mxu1 %v9207_v0 }
 0x35c   :  { %8727 = vmatpush3.msra.mxu0 %v9841_v13  ;;  %8758 = vmatpush3.msra.mxu1 %v9859_v18 }
 0x35d   :  { %8729 = vmatmul.mubr.f32.vlgmr.msra.gmra.mxu0 %v4461_v22  ;;  %8759 = vmatprep.subr.mxu1 %v9207_v0 }
 0x35e   :  { %8760 = vmatpush3.msra.mxu1 %v9869_v15  ;;  %8742 = vmatprep.subr.mxu0 %v9207_v0 }
 0x35f   :  { %8761 = vmatprep.mubr.msk.f32.mxu1 %vm9208_vm2, %v9207_v0  ;;  %8775 = vmatprep.subr.mxu1 %v9207_v0 }
 0x360   :  { %8743 = vmatpush3.msra.mxu0 %v9761_v56  ;;  %8750 = vmatprep.mubr.msk.f32.mxu0 %vm9208_vm2, %v9207_v0 }
 0x361   :  { %8744 = vmatprep.subr.mxu0 %v9207_v0 }
 0x362   :  { %8745 = vmatpush3.msra.mxu0 %v9769_v59 }
 0x363   :  { %8746 = vmatprep.subr.mxu0 %v9207_v0 }
 0x364   :  { %8747 = vmatpush3.msra.mxu0 %v9785_v62 }
 0x365   :  { %8748 = vmatprep.subr.mxu0 %v9207_v0 }
 0x366   :  { %8749 = vmatpush3.msra.mxu0 %v9802_v5 }
 0x367   :  { %8764 = vmatprep.subr.mxu0 %v9207_v0 }
 0x403   :  { %v4558_v30 = vpop.f32.mrf.mxu1 }
 0x405   :  { %v8697_v32 = vpop.f32.mrf.mxu1 }
 0x40b   :  { %v4715_v34 = vpop.f32.mrf.mxu1 }
 0x40c   :  { %v4467_v61 = vpop.f32.mrf.mxu0 }
 0x40d   :  { %v8719_v35 = vpop.f32.mrf.mxu1  ;;  %v4559_v39 = vadd.f32 %v4558_v30, %v4467_v61 }
 0x40e   :  { %v8686_v36 = vpop.f32.mrf.mxu0 }
 0x414   :  { %v4638_v37 = vpop.f32.mrf.mxu0 }
 0x415   :  { %v4873_v53 = vpop.f32.mrf.mxu1  ;;  %v4639_v44 = vadd.f32 %v4638_v37, %v4559_v39 }
 0x416   :  { %v8708_v2 = vpop.f32.mrf.mxu0 }
 0x417   :  { %v8741_v42 = vpop.f32.mrf.mxu1  ;;  %v4716_v26 = vadd.f32 %v4715_v34, %v4639_v44 }
 0x41d   :  { %v4798_v45 = vpop.f32.mrf.mxu0 }
 0x41e   :  { %v4799_v47 = vadd.f32 %v4798_v45, %v4716_v26 }
 0x41f   :  { %v8730_v48 = vpop.f32.mrf.mxu0 }
 0x420   :  { %v4874_v49 = vadd.f32 %v4873_v53, %v4799_v47 }
 0x422   :  { %v4877_v51 = vadd.f32 %v4874_v49, %v9961_v1 }
 0x424   :  { %9151 = vtanh.f32 %v4877_v51  ;;  %v8025_v52 = vmul.f32 -1.442695, %v4877_v51 }
 0x426   :  { %9153 = vpow2.f32 %v8025_v52 }
 0x431   :  { %v9152_v38 = vpop.eup %9151 }
 0x432   :  { %4887 = vrot.lane.b32.xlu0 %v9152_v38, %s9209_s3 }
 0x433   :  { %v9154_v54 = vpop.eup %9153 }
 0x434   :  { %v4881_v57 = vadd.f32 1.0, %v9154_v54 }
 0x436   :  { %9155 = vrcp.f32 %v4881_v57 }
 0x443   :  { %v9156_v58 = vpop.eup %9155 }
 0x444   :  { %v4885_v6 = vmul.f32 %v9156_v58, %v9984_v8 }
 0x4a4   :  { %v4888_v55 = vpop.permute.xlu0 %4887 }
 0x4a5   :  { %v4890_v63 = vmul.f32 %v9156_v58, %v4888_v55 }
 0x4a7   :  { %4892 = vrot.lane.b32.xlu1 %v4890_v63, %s9210_s9 }
 0x519   :  { %v4893_v40 = vpop.permute.xlu1 %4892 }
 0x51a   :  { %v10054_v11 = vadd.f32 %v4893_v40, %v4885_v6 }
 0x51c   :  { %9157 = vtanh.f32 %v10054_v11 }
 0x529   :  { %v9158_v1 = vpop.eup %9157 }
 0x52a   :  { %4898 = vrot.lane.b32.xlu0 %v9158_v1, %s9209_s3 }
 0x59c   :  { %v4899_v14 = vpop.permute.xlu0 %4898 }
 0x59d   :  { %v4901_v41 = vmul.f32 %v9156_v58, %v4899_v14 }
 0x59f   :  { %4903 = vrot.lane.b32.xlu1 %v4901_v41, %s9210_s9 }
 0x611   :  { %v4904_v23 = vpop.permute.xlu1 %4903 }
 0x612   :  { %v4905_v19 = vsel %vm3873_vm10, %v4904_v23, 0 }
 0x613   :  { %v4976_v20 = vand.u32 4294901760, %v4905_v19 }
 0x615   :  { %v4977_v21 = vsub.f32 %v4905_v19, %v4976_v20  ;;  %8762 = vmatmul.mubr.f32.vlgmr.msra.gmra.mxu1 %v4976_v20 }
 0x616   :  { %8776 = vmatpush3.msra.mxu1 %v9761_v56  ;;  %8783 = vmatprep.mubr.msk.f32.mxu1 %vm9208_vm2, %v9207_v0 }
 0x617   :  { %v4978_v8 = vand.u32 4294901760, %v4977_v21  ;;  %8777 = vmatprep.subr.mxu1 %v9207_v0 }
 0x618   :  { %8778 = vmatpush3.msra.mxu1 %v9769_v59 }
 0x619   :  { %v4979_v22 = vsub.f32 %v4977_v21, %v4978_v8  ;;  %8779 = vmatprep.subr.mxu1 %v9207_v0 }
 0x61a   :  { %8780 = vmatpush3.msra.mxu1 %v9785_v62 }
 0x61b   :  { %v4980_v24 = vand.u32 4294901760, %v4979_v22  ;;  %8781 = vmatprep.subr.mxu1 %v9207_v0 }
 0x61c   :  { %8782 = vmatpush3.msra.mxu1 %v9802_v5 }
 0x61d   :  { %8784 = vmatmul.mubr.f32.vlgmr.msra.gmra.mxu1 %v4978_v8  ;;  %8797 = vmatprep.subr.mxu1 %v9207_v0 }
 0x61e   :  { %8751 = vmatmul.mubr.f32.vlgmr.msra.gmra.mxu0 %v4980_v24  ;;  %8798 = vmatpush3.msra.mxu1 %v9761_v56 }
 0x61f   :  { %8765 = vmatpush3.msra.mxu0 %v9780_v60  ;;  %8799 = vmatprep.subr.mxu1 %v9207_v0 }
 0x620   :  { %8766 = vmatprep.subr.mxu0 %v9207_v0  ;;  %8800 = vmatpush3.msra.mxu1 %v9769_v59 }
 0x621   :  { %8767 = vmatpush3.msra.mxu0 %v9792_v3  ;;  %8801 = vmatprep.subr.mxu1 %v9207_v0 }
 0x622   :  { %8768 = vmatprep.subr.mxu0 %v9207_v0  ;;  %8802 = vmatpush3.msra.mxu1 %v9785_v62 }
 0x623   :  { %8769 = vmatpush3.msra.mxu0 %v9808_v46  ;;  %8803 = vmatprep.subr.mxu1 %v9207_v0 }
 0x624   :  { %8770 = vmatprep.subr.mxu0 %v9207_v0  ;;  %8772 = vmatprep.mubr.msk.f32.mxu0 %vm9208_vm2, %v9207_v0 }
 0x625   :  { %8771 = vmatpush3.msra.mxu0 %v9822_v9  ;;  %8804 = vmatpush3.msra.mxu1 %v9802_v5 }
 0x626   :  { %8805 = vmatprep.mubr.msk.f32.mxu1 %vm9208_vm2, %v9207_v0  ;;  %8773 = vmatmul.mubr.f32.vlgmr.msra.gmra.mxu0 %v4977_v21 }
 0x627   :  { %8786 = vmatprep.subr.mxu0 %v9207_v0  ;;  %8806 = vmatmul.mubr.f32.vlgmr.msra.gmra.mxu1 %v4976_v20 }
 0x628   :  { %8787 = vmatpush3.msra.mxu0 %v9800_v4  ;;  %8794 = vmatprep.mubr.msk.f32.mxu0 %vm9208_vm2, %v9207_v0 }
 0x629   :  { %8788 = vmatprep.subr.mxu0 %v9207_v0  ;;  %8819 = vmatprep.subr.mxu1 %v9207_v0 }
 0x62a   :  { %8789 = vmatpush3.msra.mxu0 %v9812_v7  ;;  %8820 = vmatpush3.msra.mxu1 %v9838_v12 }
 0x62b   :  { %8790 = vmatprep.subr.mxu0 %v9207_v0  ;;  %8821 = vmatprep.subr.mxu1 %v9207_v0 }
 0x62c   :  { %8791 = vmatpush3.msra.mxu0 %v9828_v10  ;;  %8822 = vmatpush3.msra.mxu1 %v9849_v16 }
 0x62d   :  { %8792 = vmatprep.subr.mxu0 %v9207_v0  ;;  %8823 = vmatprep.subr.mxu1 %v9207_v0 }
 0x62e   :  { %8793 = vmatpush3.msra.mxu0 %v9841_v13  ;;  %8824 = vmatpush3.msra.mxu1 %v9859_v18 }
 0x62f   :  { %8795 = vmatmul.mubr.f32.vlgmr.msra.gmra.mxu0 %v4976_v20  ;;  %8825 = vmatprep.subr.mxu1 %v9207_v0 }
 0x630   :  { %8826 = vmatpush3.msra.mxu1 %v9869_v15  ;;  %8808 = vmatprep.subr.mxu0 %v9207_v0 }
 0x631   :  { %8827 = vmatprep.mubr.msk.f32.mxu1 %vm9208_vm2, %v9207_v0  ;;  %8841 = vmatprep.subr.mxu1 %v9207_v0 }
 0x632   :  { %8809 = vmatpush3.msra.mxu0 %v9761_v56  ;;  %8816 = vmatprep.mubr.msk.f32.mxu0 %vm9208_vm2, %v9207_v0 }
 0x633   :  { %8810 = vmatprep.subr.mxu0 %v9207_v0 }
 0x634   :  { %8811 = vmatpush3.msra.mxu0 %v9769_v59 }
 0x635   :  { %8812 = vmatprep.subr.mxu0 %v9207_v0 }
 0x636   :  { %8813 = vmatpush3.msra.mxu0 %v9785_v62 }
 0x637   :  { %8814 = vmatprep.subr.mxu0 %v9207_v0 }
 0x638   :  { %8815 = vmatpush3.msra.mxu0 %v9802_v5 }
 0x639   :  { %8830 = vmatprep.subr.mxu0 %v9207_v0 }
 0x6d5   :  { %v5073_v25 = vpop.f32.mrf.mxu1 }
 0x6d7   :  { %v8763_v27 = vpop.f32.mrf.mxu1 }
 0x6dd   :  { %v5230_v29 = vpop.f32.mrf.mxu1 }
 0x6de   :  { %v4982_v30 = vpop.f32.mrf.mxu0 }
 0x6df   :  { %v8785_v32 = vpop.f32.mrf.mxu1  ;;  %v5074_v36 = vadd.f32 %v5073_v25, %v4982_v30 }
 0x6e0   :  { %v8752_v34 = vpop.f32.mrf.mxu0 }
 0x6e6   :  { %v5153_v61 = vpop.f32.mrf.mxu0 }
 0x6e7   :  { %v5388_v35 = vpop.f32.mrf.mxu1  ;;  %v5154_v39 = vadd.f32 %v5153_v61, %v5074_v36 }
 0x6e8   :  { %v8774_v37 = vpop.f32.mrf.mxu0 }
 0x6e9   :  { %v8807_v53 = vpop.f32.mrf.mxu1  ;;  %v5231_v2 = vadd.f32 %v5230_v29, %v5154_v39 }
 0x6ef   :  { %v5313_v42 = vpop.f32.mrf.mxu0 }
 0x6f0   :  { %v5314_v44 = vadd.f32 %v5313_v42, %v5231_v2 }
 0x6f1   :  { %v8796_v26 = vpop.f32.mrf.mxu0 }
 0x6f2   :  { %v5389_v45 = vadd.f32 %v5388_v35, %v5314_v44 }
 0x6f4   :  { %v5392_v47 = vadd.f32 %v5389_v45, %v9964_v31 }
 0x6f6   :  { %9159 = vtanh.f32 %v5392_v47  ;;  %v8026_v49 = vmul.f32 -1.442695, %v5392_v47 }
 0x6f8   :  { %9161 = vpow2.f32 %v8026_v49 }
 0x703   :  { %v9160_v48 = vpop.eup %9159 }
 0x704   :  { %5402 = vrot.lane.b32.xlu0 %v9160_v48, %s9209_s3 }
 0x705   :  { %v9162_v51 = vpop.eup %9161 }
 0x706   :  { %v5396_v38 = vadd.f32 1.0, %v9162_v51 }
 0x708   :  { %9163 = vrcp.f32 %v5396_v38 }
 0x715   :  { %v9164_v52 = vpop.eup %9163 }
 0x716   :  { %v5400_v58 = vmul.f32 %v9164_v52, %v10054_v11 }
 0x776   :  { %v5403_v54 = vpop.permute.xlu0 %5402 }
 0x777   :  { %v5405_v57 = vmul.f32 %v9164_v52, %v5403_v54 }
 0x779   :  { %5407 = vrot.lane.b32.xlu1 %v5405_v57, %s9210_s9 }
 0x7eb   :  { %v5408_v55 = vpop.permute.xlu1 %5407 }
 0x7ec   :  { %v10124_v63 = vadd.f32 %v5408_v55, %v5400_v58 }
 0x7ee   :  { %9165 = vtanh.f32 %v10124_v63 }
 0x7fb   :  { %v9166_v31 = vpop.eup %9165 }
 0x7fc   :  { %5413 = vrot.lane.b32.xlu0 %v9166_v31, %s9209_s3 }
 0x86e   :  { %v5414_v6 = vpop.permute.xlu0 %5413 }
 0x86f   :  { %v5416_v40 = vmul.f32 %v9164_v52, %v5414_v6 }
 0x871   :  { %5418 = vrot.lane.b32.xlu1 %v5416_v40, %s9210_s9 }
 0x8e3   :  { %v5419_v1 = vpop.permute.xlu1 %5418 }
 0x8e4   :  { %v5420_v14 = vsel %vm3873_vm10, %v5419_v1, 0 }
 0x8e5   :  { %v5491_v41 = vand.u32 4294901760, %v5420_v14 }
 0x8e7   :  { %v5492_v23 = vsub.f32 %v5420_v14, %v5491_v41  ;;  %8828 = vmatmul.mubr.f32.vlgmr.msra.gmra.mxu1 %v5491_v41 }
 0x8e8   :  { %8842 = vmatpush3.msra.mxu1 %v9761_v56  ;;  %8849 = vmatprep.mubr.msk.f32.mxu1 %vm9208_vm2, %v9207_v0 }
 0x8e9   :  { %v5493_v11 = vand.u32 4294901760, %v5492_v23  ;;  %8843 = vmatprep.subr.mxu1 %v9207_v0 }
 0x8ea   :  { %8844 = vmatpush3.msra.mxu1 %v9769_v59 }
 0x8eb   :  { %v5494_v19 = vsub.f32 %v5492_v23, %v5493_v11  ;;  %8845 = vmatprep.subr.mxu1 %v9207_v0 }
 0x8ec   :  { %8846 = vmatpush3.msra.mxu1 %v9785_v62 }
 0x8ed   :  { %v5495_v20 = vand.u32 4294901760, %v5494_v19  ;;  %8847 = vmatprep.subr.mxu1 %v9207_v0 }
 0x8ee   :  { %8848 = vmatpush3.msra.mxu1 %v9802_v5 }
 0x8ef   :  { %8850 = vmatmul.mubr.f32.vlgmr.msra.gmra.mxu1 %v5493_v11  ;;  %8863 = vmatprep.subr.mxu1 %v9207_v0 }
 0x8f0   :  { %8817 = vmatmul.mubr.f32.vlgmr.msra.gmra.mxu0 %v5495_v20  ;;  %8864 = vmatpush3.msra.mxu1 %v9761_v56 }
 0x8f1   :  { %8831 = vmatpush3.msra.mxu0 %v9780_v60  ;;  %8865 = vmatprep.subr.mxu1 %v9207_v0 }
 0x8f2   :  { %8832 = vmatprep.subr.mxu0 %v9207_v0  ;;  %8866 = vmatpush3.msra.mxu1 %v9769_v59 }
 0x8f3   :  { %8833 = vmatpush3.msra.mxu0 %v9792_v3  ;;  %8867 = vmatprep.subr.mxu1 %v9207_v0 }
 0x8f4   :  { %8834 = vmatprep.subr.mxu0 %v9207_v0  ;;  %8868 = vmatpush3.msra.mxu1 %v9785_v62 }
 0x8f5   :  { %8835 = vmatpush3.msra.mxu0 %v9808_v46  ;;  %8869 = vmatprep.subr.mxu1 %v9207_v0 }
 0x8f6   :  { %8836 = vmatprep.subr.mxu0 %v9207_v0  ;;  %8838 = vmatprep.mubr.msk.f32.mxu0 %vm9208_vm2, %v9207_v0 }
 0x8f7   :  { %8837 = vmatpush3.msra.mxu0 %v9822_v9  ;;  %8870 = vmatpush3.msra.mxu1 %v9802_v5 }
 0x8f8   :  { %8871 = vmatprep.mubr.msk.f32.mxu1 %vm9208_vm2, %v9207_v0  ;;  %8839 = vmatmul.mubr.f32.vlgmr.msra.gmra.mxu0 %v5492_v23 }
 0x8f9   :  { %8852 = vmatprep.subr.mxu0 %v9207_v0  ;;  %8872 = vmatmul.mubr.f32.vlgmr.msra.gmra.mxu1 %v5491_v41 }
 0x8fa   :  { %8853 = vmatpush3.msra.mxu0 %v9800_v4  ;;  %8860 = vmatprep.mubr.msk.f32.mxu0 %vm9208_vm2, %v9207_v0 }
 0x8fb   :  { %8854 = vmatprep.subr.mxu0 %v9207_v0  ;;  %8885 = vmatprep.subr.mxu1 %v9207_v0 }
 0x8fc   :  { %8855 = vmatpush3.msra.mxu0 %v9812_v7  ;;  %8886 = vmatpush3.msra.mxu1 %v9838_v12 }
 0x8fd   :  { %8856 = vmatprep.subr.mxu0 %v9207_v0  ;;  %8887 = vmatprep.subr.mxu1 %v9207_v0 }
 0x8fe   :  { %8857 = vmatpush3.msra.mxu0 %v9828_v10  ;;  %8888 = vmatpush3.msra.mxu1 %v9849_v16 }
 0x8ff   :  { %8858 = vmatprep.subr.mxu0 %v9207_v0  ;;  %8889 = vmatprep.subr.mxu1 %v9207_v0 }
 0x900   :  { %8859 = vmatpush3.msra.mxu0 %v9841_v13  ;;  %8890 = vmatpush3.msra.mxu1 %v9859_v18 }
 0x901   :  { %8861 = vmatmul.mubr.f32.vlgmr.msra.gmra.mxu0 %v5491_v41  ;;  %8891 = vmatprep.subr.mxu1 %v9207_v0 }
 0x902   :  { %8892 = vmatpush3.msra.mxu1 %v9869_v15  ;;  %8874 = vmatprep.subr.mxu0 %v9207_v0 }
 0x903   :  { %8893 = vmatprep.mubr.msk.f32.mxu1 %vm9208_vm2, %v9207_v0  ;;  %8907 = vmatprep.subr.mxu1 %v9207_v0 }
 0x904   :  { %8875 = vmatpush3.msra.mxu0 %v9761_v56  ;;  %8882 = vmatprep.mubr.msk.f32.mxu0 %vm9208_vm2, %v9207_v0 }
 0x905   :  { %8876 = vmatprep.subr.mxu0 %v9207_v0 }
 0x906   :  { %8877 = vmatpush3.msra.mxu0 %v9769_v59 }
 0x907   :  { %8878 = vmatprep.subr.mxu0 %v9207_v0 }
 0x908   :  { %8879 = vmatpush3.msra.mxu0 %v9785_v62 }
 0x909   :  { %8880 = vmatprep.subr.mxu0 %v9207_v0 }
 0x90a   :  { %8881 = vmatpush3.msra.mxu0 %v9802_v5 }
 0x90b   :  { %8896 = vmatprep.subr.mxu0 %v9207_v0 }
 0x9a7   :  { %v5588_v21 = vpop.f32.mrf.mxu1 }
 0x9a9   :  { %v8829_v8 = vpop.f32.mrf.mxu1 }
 0x9af   :  { %v5745_v22 = vpop.f32.mrf.mxu1 }
 0x9b0   :  { %v5497_v24 = vpop.f32.mrf.mxu0 }
 0x9b1   :  { %v8851_v25 = vpop.f32.mrf.mxu1  ;;  %v5589_v32 = vadd.f32 %v5588_v21, %v5497_v24 }
 0x9b2   :  { %v8818_v27 = vpop.f32.mrf.mxu0 }
 0x9b8   :  { %v5668_v29 = vpop.f32.mrf.mxu0 }
 0x9b9   :  { %v5903_v30 = vpop.f32.mrf.mxu1  ;;  %v5669_v35 = vadd.f32 %v5668_v29, %v5589_v32 }
 0x9ba   :  { %v8840_v34 = vpop.f32.mrf.mxu0 }
 0x9bb   :  { %v8873_v61 = vpop.f32.mrf.mxu1  ;;  %v5746_v36 = vadd.f32 %v5745_v22, %v5669_v35 }
 0x9c1   :  { %v5828_v37 = vpop.f32.mrf.mxu0 }
 0x9c2   :  { %v5829_v53 = vadd.f32 %v5828_v37, %v5746_v36 }
 0x9c3   :  { %v8862_v39 = vpop.f32.mrf.mxu0 }
 0x9c4   :  { %v5904_v2 = vadd.f32 %v5903_v30, %v5829_v53 }
 0x9c6   :  { %v5907_v42 = vadd.f32 %v5904_v2, %v9967_v50 }
 0x9c8   :  { %9167 = vtanh.f32 %v5907_v42  ;;  %v8027_v26 = vmul.f32 -1.442695, %v5907_v42 }
 0x9ca   :  { %9169 = vpow2.f32 %v8027_v26 }
 0x9d5   :  { %v9168_v44 = vpop.eup %9167 }
 0x9d6   :  { %5917 = vrot.lane.b32.xlu0 %v9168_v44, %s9209_s3 }
 0x9d7   :  { %v9170_v45 = vpop.eup %9169 }
 0x9d8   :  { %v5911_v47 = vadd.f32 1.0, %v9170_v45 }
 0x9da   :  { %9171 = vrcp.f32 %v5911_v47 }
 0x9e7   :  { %v9172_v48 = vpop.eup %9171 }
 0x9e8   :  { %v5915_v38 = vmul.f32 %v9172_v48, %v10124_v63 }
 0xa48   :  { %v5918_v49 = vpop.permute.xlu0 %5917 }
 0xa49   :  { %v5920_v51 = vmul.f32 %v9172_v48, %v5918_v49 }
 0xa4b   :  { %5922 = vrot.lane.b32.xlu1 %v5920_v51, %s9210_s9 }
 0xabd   :  { %v5923_v52 = vpop.permute.xlu1 %5922 }
 0xabe   :  { %v10194_v54 = vadd.f32 %v5923_v52, %v5915_v38 }
 0xac0   :  { %9173 = vtanh.f32 %v10194_v54 }
 0xacd   :  { %v9174_v50 = vpop.eup %9173 }
 0xace   :  { %5928 = vrot.lane.b32.xlu0 %v9174_v50, %s9209_s3 }
 0xb40   :  { %v5929_v57 = vpop.permute.xlu0 %5928 }
 0xb41   :  { %v5931_v58 = vmul.f32 %v9172_v48, %v5929_v57 }
 0xb43   :  { %5933 = vrot.lane.b32.xlu1 %v5931_v58, %s9210_s9 }
 0xbb5   :  { %v5934_v55 = vpop.permute.xlu1 %5933 }
 0xbb6   :  { %v5935_v31 = vsel %vm3873_vm10, %v5934_v55, 0 }
 0xbb7   :  { %v6006_v6 = vand.u32 4294901760, %v5935_v31 }
 0xbb9   :  { %v6007_v40 = vsub.f32 %v5935_v31, %v6006_v6  ;;  %8894 = vmatmul.mubr.f32.vlgmr.msra.gmra.mxu1 %v6006_v6 }
 0xbba   :  { %8908 = vmatpush3.msra.mxu1 %v9761_v56  ;;  %8915 = vmatprep.mubr.msk.f32.mxu1 %vm9208_vm2, %v9207_v0 }
 0xbbb   :  { %v6008_v63 = vand.u32 4294901760, %v6007_v40  ;;  %8909 = vmatprep.subr.mxu1 %v9207_v0 }
 0xbbc   :  { %8910 = vmatpush3.msra.mxu1 %v9769_v59 }
 0xbbd   :  { %v6009_v1 = vsub.f32 %v6007_v40, %v6008_v63  ;;  %8911 = vmatprep.subr.mxu1 %v9207_v0 }
 0xbbe   :  { %8912 = vmatpush3.msra.mxu1 %v9785_v62 }
 0xbbf   :  { %v6010_v14 = vand.u32 4294901760, %v6009_v1  ;;  %8913 = vmatprep.subr.mxu1 %v9207_v0 }
 0xbc0   :  { %8914 = vmatpush3.msra.mxu1 %v9802_v5 }
 0xbc1   :  { %8916 = vmatmul.mubr.f32.vlgmr.msra.gmra.mxu1 %v6008_v63  ;;  %8929 = vmatprep.subr.mxu1 %v9207_v0 }
 0xbc2   :  { %8883 = vmatmul.mubr.f32.vlgmr.msra.gmra.mxu0 %v6010_v14  ;;  %8930 = vmatpush3.msra.mxu1 %v9761_v56 }
 0xbc3   :  { %8897 = vmatpush3.msra.mxu0 %v9780_v60  ;;  %8931 = vmatprep.subr.mxu1 %v9207_v0 }
 0xbc4   :  { %8898 = vmatprep.subr.mxu0 %v9207_v0  ;;  %8932 = vmatpush3.msra.mxu1 %v9769_v59 }
 0xbc5   :  { %8899 = vmatpush3.msra.mxu0 %v9792_v3  ;;  %8933 = vmatprep.subr.mxu1 %v9207_v0 }
 0xbc6   :  { %8900 = vmatprep.subr.mxu0 %v9207_v0  ;;  %8934 = vmatpush3.msra.mxu1 %v9785_v62 }
 0xbc7   :  { %8901 = vmatpush3.msra.mxu0 %v9808_v46  ;;  %8935 = vmatprep.subr.mxu1 %v9207_v0 }
 0xbc8   :  { %8902 = vmatprep.subr.mxu0 %v9207_v0  ;;  %8904 = vmatprep.mubr.msk.f32.mxu0 %vm9208_vm2, %v9207_v0 }
 0xbc9   :  { %8903 = vmatpush3.msra.mxu0 %v9822_v9  ;;  %8936 = vmatpush3.msra.mxu1 %v9802_v5 }
 0xbca   :  { %8937 = vmatprep.mubr.msk.f32.mxu1 %vm9208_vm2, %v9207_v0  ;;  %8905 = vmatmul.mubr.f32.vlgmr.msra.gmra.mxu0 %v6007_v40 }
 0xbcb   :  { %8918 = vmatprep.subr.mxu0 %v9207_v0  ;;  %8938 = vmatmul.mubr.f32.vlgmr.msra.gmra.mxu1 %v6006_v6 }
 0xbcc   :  { %8919 = vmatpush3.msra.mxu0 %v9800_v4  ;;  %8926 = vmatprep.mubr.msk.f32.mxu0 %vm9208_vm2, %v9207_v0 }
 0xbcd   :  { %8920 = vmatprep.subr.mxu0 %v9207_v0  ;;  %8951 = vmatprep.subr.mxu1 %v9207_v0 }
 0xbce   :  { %8921 = vmatpush3.msra.mxu0 %v9812_v7  ;;  %8952 = vmatpush3.msra.mxu1 %v9838_v12 }
 0xbcf   :  { %8922 = vmatprep.subr.mxu0 %v9207_v0  ;;  %8953 = vmatprep.subr.mxu1 %v9207_v0 }
 0xbd0   :  { %8923 = vmatpush3.msra.mxu0 %v9828_v10  ;;  %8954 = vmatpush3.msra.mxu1 %v9849_v16 }
 0xbd1   :  { %8924 = vmatprep.subr.mxu0 %v9207_v0  ;;  %8955 = vmatprep.subr.mxu1 %v9207_v0 }
 0xbd2   :  { %8925 = vmatpush3.msra.mxu0 %v9841_v13  ;;  %8956 = vmatpush3.msra.mxu1 %v9859_v18 }
 0xbd3   :  { %8927 = vmatmul.mubr.f32.vlgmr.msra.gmra.mxu0 %v6006_v6  ;;  %8957 = vmatprep.subr.mxu1 %v9207_v0 }
 0xbd4   :  { %8958 = vmatpush3.msra.mxu1 %v9869_v15  ;;  %8940 = vmatprep.subr.mxu0 %v9207_v0 }
 0xbd5   :  { %8959 = vmatprep.mubr.msk.f32.mxu1 %vm9208_vm2, %v9207_v0  ;;  %8973 = vmatprep.subr.mxu1 %v9207_v0 }
 0xbd6   :  { %8941 = vmatpush3.msra.mxu0 %v9761_v56  ;;  %8948 = vmatprep.mubr.msk.f32.mxu0 %vm9208_vm2, %v9207_v0 }
 0xbd7   :  { %8942 = vmatprep.subr.mxu0 %v9207_v0 }
 0xbd8   :  { %8943 = vmatpush3.msra.mxu0 %v9769_v59 }
 0xbd9   :  { %8944 = vmatprep.subr.mxu0 %v9207_v0 }
 0xbda   :  { %8945 = vmatpush3.msra.mxu0 %v9785_v62 }
 0xbdb   :  { %8946 = vmatprep.subr.mxu0 %v9207_v0 }
 0xbdc   :  { %8947 = vmatpush3.msra.mxu0 %v9802_v5 }
 0xbdd   :  { %8962 = vmatprep.subr.mxu0 %v9207_v0 }
 0xc79   :  { %v6103_v41 = vpop.f32.mrf.mxu1 }
 0xc7b   :  { %v8895_v23 = vpop.f32.mrf.mxu1 }
 0xc81   :  { %v6260_v11 = vpop.f32.mrf.mxu1 }
 0xc82   :  { %v6012_v19 = vpop.f32.mrf.mxu0 }
 0xc83   :  { %v8917_v20 = vpop.f32.mrf.mxu1  ;;  %v6104_v24 = vadd.f32 %v6103_v41, %v6012_v19 }
 0xc84   :  { %v8884_v21 = vpop.f32.mrf.mxu0 }
 0xc8a   :  { %v6183_v8 = vpop.f32.mrf.mxu0 }
 0xc8b   :  { %v6418_v22 = vpop.f32.mrf.mxu1  ;;  %v6184_v29 = vadd.f32 %v6183_v8, %v6104_v24 }
 0xc8c   :  { %v8906_v25 = vpop.f32.mrf.mxu0 }
 0xc8d   :  { %v8939_v27 = vpop.f32.mrf.mxu1  ;;  %v6261_v30 = vadd.f32 %v6260_v11, %v6184_v29 }
 0xc93   :  { %v6343_v32 = vpop.f32.mrf.mxu0 }
 0xc94   :  { %v6344_v34 = vadd.f32 %v6343_v32, %v6261_v30 }
 0xc95   :  { %v8928_v61 = vpop.f32.mrf.mxu0 }
 0xc96   :  { %v6419_v35 = vadd.f32 %v6418_v22, %v6344_v34 }
 0xc98   :  { %v6422_v36 = vadd.f32 %v6419_v35, %v9970_v17 }
 0xc9a   :  { %9175 = vtanh.f32 %v6422_v36  ;;  %v8028_v53 = vmul.f32 -1.442695, %v6422_v36 }
 0xc9c   :  { %9177 = vpow2.f32 %v8028_v53 }
 0xca7   :  { %v9176_v37 = vpop.eup %9175 }
 0xca8   :  { %6432 = vrot.lane.b32.xlu0 %v9176_v37, %s9209_s3 }
 0xca9   :  { %v9178_v39 = vpop.eup %9177 }
 0xcaa   :  { %v6426_v2 = vadd.f32 1.0, %v9178_v39 }
 0xcac   :  { %9179 = vrcp.f32 %v6426_v2 }
 0xcb9   :  { %v9180_v42 = vpop.eup %9179 }
 0xcba   :  { %v6430_v45 = vmul.f32 %v9180_v42, %v10194_v54 }
 0xd1a   :  { %v6433_v44 = vpop.permute.xlu0 %6432 }
 0xd1b   :  { %v6435_v26 = vmul.f32 %v9180_v42, %v6433_v44 }
 0xd1d   :  { %6437 = vrot.lane.b32.xlu1 %v6435_v26, %s9210_s9 }
 0xd8f   :  { %v6438_v47 = vpop.permute.xlu1 %6437 }
 0xd90   :  { %v10264_v48 = vadd.f32 %v6438_v47, %v6430_v45 }
 0xd92   :  { %9181 = vtanh.f32 %v10264_v48 }
 0xd9f   :  { %v9182_v17 = vpop.eup %9181 }
 0xda0   :  { %6443 = vrot.lane.b32.xlu0 %v9182_v17, %s9209_s3 }
 0xe12   :  { %v6444_v49 = vpop.permute.xlu0 %6443 }
 0xe13   :  { %v6446_v51 = vmul.f32 %v9180_v42, %v6444_v49 }
 0xe15   :  { %6448 = vrot.lane.b32.xlu1 %v6446_v51, %s9210_s9 }
 0xe87   :  { %v6449_v38 = vpop.permute.xlu1 %6448 }
 0xe88   :  { %v6450_v52 = vsel %vm3873_vm10, %v6449_v38, 0 }
 0xe89   :  { %v6521_v50 = vand.u32 4294901760, %v6450_v52 }
 0xe8b   :  { %v6522_v57 = vsub.f32 %v6450_v52, %v6521_v50  ;;  %8960 = vmatmul.mubr.f32.vlgmr.msra.gmra.mxu1 %v6521_v50 }
 0xe8c   :  { %8974 = vmatpush3.msra.mxu1 %v9761_v56  ;;  %8981 = vmatprep.mubr.msk.f32.mxu1 %vm9208_vm2, %v9207_v0 }
 0xe8d   :  { %v6523_v54 = vand.u32 4294901760, %v6522_v57  ;;  %8975 = vmatprep.subr.mxu1 %v9207_v0 }
 0xe8e   :  { %8976 = vmatpush3.msra.mxu1 %v9769_v59 }
 0xe8f   :  { %v6524_v58 = vsub.f32 %v6522_v57, %v6523_v54  ;;  %8977 = vmatprep.subr.mxu1 %v9207_v0 }
 0xe90   :  { %8978 = vmatpush3.msra.mxu1 %v9785_v62 }
 0xe91   :  { %v6525_v55 = vand.u32 4294901760, %v6524_v58  ;;  %8979 = vmatprep.subr.mxu1 %v9207_v0 }
 0xe92   :  { %8980 = vmatpush3.msra.mxu1 %v9802_v5 }
 0xe93   :  { %8982 = vmatmul.mubr.f32.vlgmr.msra.gmra.mxu1 %v6523_v54  ;;  %8995 = vmatprep.subr.mxu1 %v9207_v0 }
 0xe94   :  { %8949 = vmatmul.mubr.f32.vlgmr.msra.gmra.mxu0 %v6525_v55  ;;  %8996 = vmatpush3.msra.mxu1 %v9761_v56 }
 0xe95   :  { %8963 = vmatpush3.msra.mxu0 %v9780_v60  ;;  %8997 = vmatprep.subr.mxu1 %v9207_v0 }
 0xe96   :  { %8964 = vmatprep.subr.mxu0 %v9207_v0  ;;  %8998 = vmatpush3.msra.mxu1 %v9769_v59 }
 0xe97   :  { %8965 = vmatpush3.msra.mxu0 %v9792_v3  ;;  %8999 = vmatprep.subr.mxu1 %v9207_v0 }
 0xe98   :  { %8966 = vmatprep.subr.mxu0 %v9207_v0  ;;  %9000 = vmatpush3.msra.mxu1 %v9785_v62 }
 0xe99   :  { %8967 = vmatpush3.msra.mxu0 %v9808_v46  ;;  %9001 = vmatprep.subr.mxu1 %v9207_v0 }
 0xe9a   :  { %8968 = vmatprep.subr.mxu0 %v9207_v0  ;;  %8970 = vmatprep.mubr.msk.f32.mxu0 %vm9208_vm2, %v9207_v0 }
 0xe9b   :  { %8969 = vmatpush3.msra.mxu0 %v9822_v9  ;;  %9002 = vmatpush3.msra.mxu1 %v9802_v5 }
 0xe9c   :  { %9003 = vmatprep.mubr.msk.f32.mxu1 %vm9208_vm2, %v9207_v0  ;;  %8971 = vmatmul.mubr.f32.vlgmr.msra.gmra.mxu0 %v6522_v57 }
 0xe9d   :  { %8984 = vmatprep.subr.mxu0 %v9207_v0  ;;  %9004 = vmatmul.mubr.f32.vlgmr.msra.gmra.mxu1 %v6521_v50 }
 0xe9e   :  { %8985 = vmatpush3.msra.mxu0 %v9800_v4  ;;  %8992 = vmatprep.mubr.msk.f32.mxu0 %vm9208_vm2, %v9207_v0 }
 0xe9f   :  { %8986 = vmatprep.subr.mxu0 %v9207_v0  ;;  %9017 = vmatprep.subr.mxu1 %v9207_v0 }
 0xea0   :  { %8987 = vmatpush3.msra.mxu0 %v9812_v7  ;;  %9018 = vmatpush3.msra.mxu1 %v9838_v12 }
 0xea1   :  { %8988 = vmatprep.subr.mxu0 %v9207_v0  ;;  %9019 = vmatprep.subr.mxu1 %v9207_v0 }
 0xea2   :  { %8989 = vmatpush3.msra.mxu0 %v9828_v10  ;;  %9020 = vmatpush3.msra.mxu1 %v9849_v16 }
 0xea3   :  { %8990 = vmatprep.subr.mxu0 %v9207_v0  ;;  %9021 = vmatprep.subr.mxu1 %v9207_v0 }
 0xea4   :  { %8991 = vmatpush3.msra.mxu0 %v9841_v13  ;;  %9022 = vmatpush3.msra.mxu1 %v9859_v18 }
 0xea5   :  { %8993 = vmatmul.mubr.f32.vlgmr.msra.gmra.mxu0 %v6521_v50  ;;  %9023 = vmatprep.subr.mxu1 %v9207_v0 }
 0xea6   :  { %9024 = vmatpush3.msra.mxu1 %v9869_v15  ;;  %9006 = vmatprep.subr.mxu0 %v9207_v0 }
 0xea7   :  { %9025 = vmatprep.mubr.msk.f32.mxu1 %vm9208_vm2, %v9207_v0  ;;  %9039 = vmatprep.subr.mxu1 %v9207_v0 }
 0xea8   :  { %9007 = vmatpush3.msra.mxu0 %v9761_v56  ;;  %9014 = vmatprep.mubr.msk.f32.mxu0 %vm9208_vm2, %v9207_v0 }
 0xea9   :  { %9008 = vmatprep.subr.mxu0 %v9207_v0 }
 0xeaa   :  { %9009 = vmatpush3.msra.mxu0 %v9769_v59 }
 0xeab   :  { %9010 = vmatprep.subr.mxu0 %v9207_v0 }
 0xeac   :  { %9011 = vmatpush3.msra.mxu0 %v9785_v62 }
 0xead   :  { %9012 = vmatprep.subr.mxu0 %v9207_v0 }
 0xeae   :  { %9013 = vmatpush3.msra.mxu0 %v9802_v5 }
 0xeaf   :  { %9028 = vmatprep.subr.mxu0 %v9207_v0 }
 0xf4b   :  { %v6618_v31 = vpop.f32.mrf.mxu1 }
 0xf4d   :  { %v8961_v6 = vpop.f32.mrf.mxu1 }
 0xf53   :  { %v6775_v40 = vpop.f32.mrf.mxu1 }
 0xf54   :  { %v6527_v63 = vpop.f32.mrf.mxu0 }
 0xf55   :  { %v8983_v1 = vpop.f32.mrf.mxu1  ;;  %v6619_v11 = vadd.f32 %v6618_v31, %v6527_v63 }
 0xf56   :  { %v8950_v14 = vpop.f32.mrf.mxu0 }
 0xf5c   :  { %v6698_v41 = vpop.f32.mrf.mxu0 }
 0xf5d   :  { %v6933_v23 = vpop.f32.mrf.mxu1  ;;  %v6699_v21 = vadd.f32 %v6698_v41, %v6619_v11 }
 0xf5e   :  { %v8972_v19 = vpop.f32.mrf.mxu0 }
 0xf5f   :  { %v9005_v20 = vpop.f32.mrf.mxu1  ;;  %v6776_v8 = vadd.f32 %v6775_v40, %v6699_v21 }
 0xf65   :  { %v6858_v22 = vpop.f32.mrf.mxu0 }
 0xf66   :  { %v6859_v24 = vadd.f32 %v6858_v22, %v6776_v8 }
 0xf67   :  { %v8994_v25 = vpop.f32.mrf.mxu0 }
 0xf68   :  { %v6934_v27 = vadd.f32 %v6933_v23, %v6859_v24 }
 0xf6a   :  { %v6937_v29 = vadd.f32 %v6934_v27, %v9973_v43 }
 0xf6c   :  { %9183 = vtanh.f32 %v6937_v29  ;;  %v8029_v32 = vmul.f32 -1.442695, %v6937_v29 }
 0xf6e   :  { %9185 = vpow2.f32 %v8029_v32 }
 0xf79   :  { %v9184_v30 = vpop.eup %9183 }
 0xf7a   :  { %6947 = vrot.lane.b32.xlu0 %v9184_v30, %s9209_s3 }
 0xf7b   :  { %v9186_v34 = vpop.eup %9185 }
 0xf7c   :  { %v6941_v61 = vadd.f32 1.0, %v9186_v34 }
 0xf7e   :  { %9187 = vrcp.f32 %v6941_v61 }
 0xf8b   :  { %v9188_v35 = vpop.eup %9187 }
 0xf8c   :  { %v6945_v53 = vmul.f32 %v9188_v35, %v10264_v48 }
 0xfec   :  { %v6948_v36 = vpop.permute.xlu0 %6947 }
 0xfed   :  { %v6950_v37 = vmul.f32 %v9188_v35, %v6948_v36 }
 0xfef   :  { %6952 = vrot.lane.b32.xlu1 %v6950_v37, %s9210_s9 }
0x1061   :  { %v6953_v39 = vpop.permute.xlu1 %6952 }
0x1062   :  { %v10334_v2 = vadd.f32 %v6953_v39, %v6945_v53 }
0x1064   :  { %9189 = vtanh.f32 %v10334_v2 }
0x1071   :  { %v9190_v43 = vpop.eup %9189 }
0x1072   :  { %6958 = vrot.lane.b32.xlu0 %v9190_v43, %s9209_s3 }
0x10e4   :  { %v6959_v42 = vpop.permute.xlu0 %6958 }
0x10e5   :  { %v6961_v44 = vmul.f32 %v9188_v35, %v6959_v42 }
0x10e7   :  { %6963 = vrot.lane.b32.xlu1 %v6961_v44, %s9210_s9 }
0x1159   :  { %v6964_v26 = vpop.permute.xlu1 %6963 }
0x115a   :  { %v6965_v45 = vsel %vm3873_vm10, %v6964_v26, 0 }
0x115b   :  { %v7036_v47 = vand.u32 4294901760, %v6965_v45 }
0x115d   :  { %v7037_v17 = vsub.f32 %v6965_v45, %v7036_v47  ;;  %9026 = vmatmul.mubr.f32.vlgmr.msra.gmra.mxu1 %v7036_v47 }
0x115e   :  { %9040 = vmatpush3.msra.mxu1 %v9761_v56  ;;  %9047 = vmatprep.mubr.msk.f32.mxu1 %vm9208_vm2, %v9207_v0 }
0x115f   :  { %v7038_v48 = vand.u32 4294901760, %v7037_v17  ;;  %9041 = vmatprep.subr.mxu1 %v9207_v0 }
0x1160   :  { %9042 = vmatpush3.msra.mxu1 %v9769_v59 }
0x1161   :  { %v7039_v49 = vsub.f32 %v7037_v17, %v7038_v48  ;;  %9043 = vmatprep.subr.mxu1 %v9207_v0 }
0x1162   :  { %9044 = vmatpush3.msra.mxu1 %v9785_v62 }
0x1163   :  { %v7040_v51 = vand.u32 4294901760, %v7039_v49  ;;  %9045 = vmatprep.subr.mxu1 %v9207_v0 }
0x1164   :  { %9046 = vmatpush3.msra.mxu1 %v9802_v5 }
0x1165   :  { %9048 = vmatmul.mubr.f32.vlgmr.msra.gmra.mxu1 %v7038_v48  ;;  %9061 = vmatprep.subr.mxu1 %v9207_v0 }
0x1166   :  { %9015 = vmatmul.mubr.f32.vlgmr.msra.gmra.mxu0 %v7040_v51  ;;  %9062 = vmatpush3.msra.mxu1 %v9761_v56 }
0x1167   :  { %9029 = vmatpush3.msra.mxu0 %v9780_v60  ;;  %9063 = vmatprep.subr.mxu1 %v9207_v0 }
0x1168   :  { %9030 = vmatprep.subr.mxu0 %v9207_v0  ;;  %9064 = vmatpush3.msra.mxu1 %v9769_v59 }
0x1169   :  { %9031 = vmatpush3.msra.mxu0 %v9792_v3  ;;  %9065 = vmatprep.subr.mxu1 %v9207_v0 }
0x116a   :  { %9032 = vmatprep.subr.mxu0 %v9207_v0  ;;  %9066 = vmatpush3.msra.mxu1 %v9785_v62 }
0x116b   :  { %9033 = vmatpush3.msra.mxu0 %v9808_v46  ;;  %9067 = vmatprep.subr.mxu1 %v9207_v0 }
0x116c   :  { %9034 = vmatprep.subr.mxu0 %v9207_v0  ;;  %9036 = vmatprep.mubr.msk.f32.mxu0 %vm9208_vm2, %v9207_v0 }
0x116d   :  { %9035 = vmatpush3.msra.mxu0 %v9822_v9  ;;  %9068 = vmatpush3.msra.mxu1 %v9802_v5 }
0x116e   :  { %9069 = vmatprep.mubr.msk.f32.mxu1 %vm9208_vm2, %v9207_v0  ;;  %9037 = vmatmul.mubr.f32.vlgmr.msra.gmra.mxu0 %v7037_v17 }
0x116f   :  { %9050 = vmatprep.subr.mxu0 %v9207_v0  ;;  %9070 = vmatmul.mubr.f32.vlgmr.msra.gmra.mxu1 %v7036_v47 }
0x1170   :  { %9051 = vmatpush3.msra.mxu0 %v9800_v4  ;;  %9058 = vmatprep.mubr.msk.f32.mxu0 %vm9208_vm2, %v9207_v0 }
0x1171   :  { %9052 = vmatprep.subr.mxu0 %v9207_v0  ;;  %9083 = vmatprep.subr.mxu1 %v9207_v0 }
0x1172   :  { %9053 = vmatpush3.msra.mxu0 %v9812_v7  ;;  %9084 = vmatpush3.msra.mxu1 %v9838_v12 }
0x1173   :  { %9054 = vmatprep.subr.mxu0 %v9207_v0  ;;  %9085 = vmatprep.subr.mxu1 %v9207_v0 }
0x1174   :  { %9055 = vmatpush3.msra.mxu0 %v9828_v10  ;;  %9086 = vmatpush3.msra.mxu1 %v9849_v16 }
0x1175   :  { %9056 = vmatprep.subr.mxu0 %v9207_v0  ;;  %9087 = vmatprep.subr.mxu1 %v9207_v0 }
0x1176   :  { %9057 = vmatpush3.msra.mxu0 %v9841_v13  ;;  %9088 = vmatpush3.msra.mxu1 %v9859_v18 }
0x1177   :  { %9059 = vmatmul.mubr.f32.vlgmr.msra.gmra.mxu0 %v7036_v47  ;;  %9089 = vmatprep.subr.mxu1 %v9207_v0 }
0x1178   :  { %9090 = vmatpush3.msra.mxu1 %v9869_v15  ;;  %9072 = vmatprep.subr.mxu0 %v9207_v0 }
0x1179   :  { %9091 = vmatprep.mubr.msk.f32.mxu1 %vm9208_vm2, %v9207_v0  ;;  %9105 = vmatprep.subr.mxu1 %v9207_v0 }
0x117a   :  { %9073 = vmatpush3.msra.mxu0 %v9761_v56  ;;  %9080 = vmatprep.mubr.msk.f32.mxu0 %vm9208_vm2, %v9207_v0 }
0x117b   :  { %9074 = vmatprep.subr.mxu0 %v9207_v0 }
0x117c   :  { %9075 = vmatpush3.msra.mxu0 %v9769_v59 }
0x117d   :  { %9076 = vmatprep.subr.mxu0 %v9207_v0 }
0x117e   :  { %9077 = vmatpush3.msra.mxu0 %v9785_v62 }
0x117f   :  { %9078 = vmatprep.subr.mxu0 %v9207_v0 }
0x1180   :  { %9079 = vmatpush3.msra.mxu0 %v9802_v5 }
0x1181   :  { %9094 = vmatprep.subr.mxu0 %v9207_v0 }
0x121d   :  { %v7133_v12 = vpop.f32.mrf.mxu1 }
0x121f   :  { %v9027_v16 = vpop.f32.mrf.mxu1 }
0x1225   :  { %v7290_v18 = vpop.f32.mrf.mxu1 }
0x1226   :  { %v7042_v15 = vpop.f32.mrf.mxu0 }
0x1227   :  { %v9049_v38 = vpop.f32.mrf.mxu1  ;;  %v7134_v54 = vadd.f32 %v7133_v12, %v7042_v15  ;;  %v8032_v12 = vld [vmem:[%s10468_s4] ss:$0 sm:$0xff] }
0x1228   :  { %v9016_v52 = vpop.f32.mrf.mxu0  ;;  %v11_v38 = vstv %s10469_s5 }
0x1229   :  { %12 = vst [vmem:[#allocation2] sm:$0x1] %v11_v38 }
0x122e   :  { %v7213_v50 = vpop.f32.mrf.mxu0 }
0x122f   :  { %v7448_v57 = vpop.f32.mrf.mxu1  ;;  %v7214_v31 = vadd.f32 %v7213_v50, %v7134_v54 }
0x1230   :  { %v9038_v58 = vpop.f32.mrf.mxu0 }
0x1231   :  { %v9071_v55 = vpop.f32.mrf.mxu1  ;;  %v7291_v6 = vadd.f32 %v7290_v18, %v7214_v31  ;;  %v8033_v31 = vld [vmem:[#allocation2] ss:$0 sm:$0xff] }
0x1237   :  { %v7373_v40 = vpop.f32.mrf.mxu0 }
0x1238   :  { %v7374_v63 = vadd.f32 %v7373_v40, %v7291_v6 }
0x1239   :  { %v9060_v1 = vpop.f32.mrf.mxu0 }
0x123a   :  { %v7449_v14 = vadd.f32 %v7448_v57, %v7374_v63 }
0x123c   :  { %v7452_v41 = vadd.f32 %v7449_v14, %v9976_v28 }
0x123e   :  { %9191 = vtanh.f32 %v7452_v41  ;;  %v8030_v11 = vmul.f32 -1.442695, %v7452_v41 }
0x1240   :  { %9193 = vpow2.f32 %v8030_v11 }
0x124b   :  { %v9192_v23 = vpop.eup %9191 }
0x124c   :  { %7462 = vrot.lane.b32.xlu0 %v9192_v23, %s9209_s3 }
0x124d   :  { %v9194_v19 = vpop.eup %9193 }
0x124e   :  { %v7456_v20 = vadd.f32 1.0, %v9194_v19 }
0x1250   :  { %9195 = vrcp.f32 %v7456_v20 }
0x125d   :  { %v9196_v21 = vpop.eup %9195 }
0x125e   :  { %v7460_v24 = vmul.f32 %v9196_v21, %v10334_v2 }
0x12be   :  { %v7463_v8 = vpop.permute.xlu0 %7462 }
0x12bf   :  { %v7465_v22 = vmul.f32 %v9196_v21, %v7463_v8 }
0x12c1   :  { %7467 = vrot.lane.b32.xlu1 %v7465_v22, %s9210_s9 }
0x1333   :  { %v7468_v25 = vpop.permute.xlu1 %7467 }
0x1334   :  { %v10404_v27 = vadd.f32 %v7468_v25, %v7460_v24 }
0x1336   :  { %9197 = vtanh.f32 %v10404_v27 }
0x1343   :  { %v9198_v28 = vpop.eup %9197 }
0x1344   :  { %7473 = vrot.lane.b32.xlu0 %v9198_v28, %s9209_s3 }
0x13b6   :  { %v7474_v29 = vpop.permute.xlu0 %7473 }
0x13b7   :  { %v7476_v30 = vmul.f32 %v9196_v21, %v7474_v29 }
0x13b9   :  { %7478 = vrot.lane.b32.xlu1 %v7476_v30, %s9210_s9 }
0x142b   :  { %v7479_v32 = vpop.permute.xlu1 %7478 }
0x142c   :  { %v7480_v34 = vsel %vm3873_vm10, %v7479_v32, 0 }
0x142d   :  { %v7551_v61 = vand.u32 4294901760, %v7480_v34 }
0x142f   :  { %v7552_v35 = vsub.f32 %v7480_v34, %v7551_v61  ;;  %9092 = vmatmul.mubr.f32.vlgmr.msra.gmra.mxu1 %v7551_v61 }
0x1430   :  { %9106 = vmatpush3.msra.mxu1 %v9761_v56  ;;  %9113 = vmatprep.mubr.msk.f32.mxu1 %vm9208_vm2, %v9207_v0 }
0x1431   :  { %v7553_v36 = vand.u32 4294901760, %v7552_v35  ;;  %9107 = vmatprep.subr.mxu1 %v9207_v0 }
0x1432   :  { %9108 = vmatpush3.msra.mxu1 %v9769_v59 }
0x1433   :  { %v7554_v37 = vsub.f32 %v7552_v35, %v7553_v36  ;;  %9109 = vmatprep.subr.mxu1 %v9207_v0 }
0x1434   :  { %9110 = vmatpush3.msra.mxu1 %v9785_v62 }
0x1435   :  { %v7555_v53 = vand.u32 4294901760, %v7554_v37  ;;  %9111 = vmatprep.subr.mxu1 %v9207_v0 }
0x1436   :  { %9112 = vmatpush3.msra.mxu1 %v9802_v5 }
0x1437   :  { %9114 = vmatmul.mubr.f32.vlgmr.msra.gmra.mxu1 %v7553_v36  ;;  %9127 = vmatprep.subr.mxu1 %v9207_v0 }
0x1438   :  { %9081 = vmatmul.mubr.f32.vlgmr.msra.gmra.mxu0 %v7555_v53  ;;  %9128 = vmatpush3.msra.mxu1 %v9761_v56 }
0x1439   :  { %9095 = vmatpush3.msra.mxu0 %v9780_v60  ;;  %9129 = vmatprep.subr.mxu1 %v9207_v0 }
0x143a   :  { %9096 = vmatprep.subr.mxu0 %v9207_v0  ;;  %9130 = vmatpush3.msra.mxu1 %v9769_v59 }
0x143b   :  { %9097 = vmatpush3.msra.mxu0 %v9792_v3  ;;  %9131 = vmatprep.subr.mxu1 %v9207_v0 }
0x143c   :  { %9098 = vmatprep.subr.mxu0 %v9207_v0  ;;  %9132 = vmatpush3.msra.mxu1 %v9785_v62 }
0x143d   :  { %9099 = vmatpush3.msra.mxu0 %v9808_v46  ;;  %9133 = vmatprep.subr.mxu1 %v9207_v0 }
0x143e   :  { %9100 = vmatprep.subr.mxu0 %v9207_v0  ;;  %9102 = vmatprep.mubr.msk.f32.mxu0 %vm9208_vm2, %v9207_v0 }
0x143f   :  { %9101 = vmatpush3.msra.mxu0 %v9822_v9  ;;  %9134 = vmatpush3.msra.mxu1 %v9802_v5 }
0x1440   :  { %9135 = vmatprep.mubr.msk.f32.mxu1 %vm9208_vm2, %v9207_v0  ;;  %9103 = vmatmul.mubr.f32.vlgmr.msra.gmra.mxu0 %v7552_v35 }
0x1441   :  { %9116 = vmatprep.subr.mxu0 %v9207_v0  ;;  %9136 = vmatmul.mubr.f32.vlgmr.msra.gmra.mxu1 %v7551_v61 }
0x1442   :  { %9117 = vmatpush3.msra.mxu0 %v9800_v4  ;;  %9124 = vmatprep.mubr.msk.f32.mxu0 %vm9208_vm2, %v9207_v0 }
0x1443   :  { %9118 = vmatprep.subr.mxu0 %v9207_v0 }
0x1444   :  { %9119 = vmatpush3.msra.mxu0 %v9812_v7 }
0x1445   :  { %9120 = vmatprep.subr.mxu0 %v9207_v0 }
0x1446   :  { %9121 = vmatpush3.msra.mxu0 %v9828_v10 }
0x1447   :  { %9122 = vmatprep.subr.mxu0 %v9207_v0 }
0x1448   :  { %9123 = vmatpush3.msra.mxu0 %v9841_v13 }
0x1449   :  { %9125 = vmatmul.mubr.f32.vlgmr.msra.gmra.mxu0 %v7551_v61 }
0x14ef   :  { %v7648_v56 = vpop.f32.mrf.mxu1 }
0x14f1   :  { %v9093_v59 = vpop.f32.mrf.mxu1 }
0x14f7   :  { %v7805_v60 = vpop.f32.mrf.mxu1 }
0x14f8   :  { %v7557_v62 = vpop.f32.mrf.mxu0 }
0x14f9   :  { %v9115_v3 = vpop.f32.mrf.mxu1  ;;  %v7649_v9 = vadd.f32 %v7648_v56, %v7557_v62 }
0x14fa   :  { %v9082_v4 = vpop.f32.mrf.mxu0 }
0x1500   :  { %v7728_v5 = vpop.f32.mrf.mxu0 }
0x1501   :  { %v7963_v46 = vpop.f32.mrf.mxu1  ;;  %v7729_v2 = vadd.f32 %v7728_v5, %v7649_v9 }
0x1502   :  { %v9104_v39 = vpop.f32.mrf.mxu0 }
0x1503   :  { %v9137_v7 = vpop.f32.mrf.mxu1  ;;  %v7806_v43 = vadd.f32 %v7805_v60, %v7729_v2 }
0x1509   :  { %v7888_v42 = vpop.f32.mrf.mxu0 }
0x150a   :  { %v7889_v10 = vadd.f32 %v7888_v42, %v7806_v43 }
0x150b   :  { %v9126_v44 = vpop.f32.mrf.mxu0 }
0x150c   :  { %v7964_v0 = vadd.f32 %v7963_v46, %v7889_v10 }
0x150e   :  { %v7967_v13 = vadd.f32 %v7964_v0, %v9979_v33 }
0x1510   :  { %9199 = vtanh.f32 %v7967_v13  ;;  %v8031_v45 = vmul.f32 -1.442695, %v7967_v13 }
0x1512   :  { %9201 = vpow2.f32 %v8031_v45 }
0x151d   :  { %v9200_v26 = vpop.eup %9199 }
0x151e   :  { %7977 = vrot.lane.b32.xlu0 %v9200_v26, %s9209_s3 }
0x151f   :  { %v9202_v47 = vpop.eup %9201 }
0x1520   :  { %v7971_v17 = vadd.f32 1.0, %v9202_v47 }
0x1522   :  { %9203 = vrcp.f32 %v7971_v17 }
0x152f   :  { %v9204_v48 = vpop.eup %9203 }
0x1530   :  { %v7975_v33 = vmul.f32 %v9204_v48, %v10404_v27 }
0x1590   :  { %v7978_v49 = vpop.permute.xlu0 %7977 }
0x1591   :  { %v7980_v51 = vmul.f32 %v9204_v48, %v7978_v49 }
0x1593   :  { %7982 = vrot.lane.b32.xlu1 %v7980_v51, %s9210_s9 }
0x1597   :  { %7999 = vrot.lane.b32.xlu1 %v8032_v12, %s9211_s12 }
0x1605   :  { %v7983_v16 = vpop.permute.xlu1 %7982 }
0x1606   :  { %v7985_v18 = vadd.f32 %v7983_v16, %v7975_v33 }
0x1608   :  { %9205 = vtanh.f32 %v7985_v18 }
0x1609   :  { %v8000_v50 = vpop.permute.xlu1 %7999 }
0x1615   :  { %v9206_v15 = vpop.eup %9205 }
0x1616   :  { %7988 = vrot.lane.b32.xlu0 %v9206_v15, %s9209_s3 }
0x1688   :  { %v7989_v52 = vpop.permute.xlu0 %7988 }
0x1689   :  { %v7991_v57 = vmul.f32 %v9204_v48, %v7989_v52 }
0x168b   :  { %v8002_v54 = vmul.f32 %v8000_v50, %v7991_v57 }
0x168d   :  { %8004 = vrot.lane.b32.xlu0 %v8002_v54, %s9210_s9 }
0x16ff   :  { %v8005_v58 = vpop.permute.xlu0 %8004 }
0x1700   :  { %v8007_v55 = vsel %vm3873_vm10, %v8005_v58, 0.0 }
0x1701   :  { %8008 = vadd.xlane.f32.xlu1 %v8007_v55 }
0x178a   :  { %v8009_v6 = vpop.xlane.xlu1 %8008 }
0x178b   :  { %v8016_v40 = vadd.f32 %v8033_v31, %v8009_v6 }
0x178d   :  { %8018 = vst.msk [vmem:[%s10470_s6] sm:$0xff] %vm8017_vm11, %v8016_v40 }

</bundles_post_ra>
